<compile_context>
chip_gen: v6e
topology: v6e:2x2x1
jax: 0.10.0
libtpu: 0.0.40
codegen_flags: <defaults>
</compile_context>

<pallas_src>
import functools

import jax
import jax.numpy as jnp
from jax.experimental import pallas as pl
from jax.experimental.pallas import tpu as pltpu

EXPANSION = 4
BN_EPS = 1e-5


# ------------------------------ fused kernel ------------------------------- #

def _bottleneck_kernel(x_ref, w1_ref, s1_ref, b1_ref,
                       w2_ref, s2_ref, b2_ref,
                       w3_ref, s3_ref, b3_ref,
                       o_ref, *, H, W, cin, planes, cout, compute_dtype):
    """One batch image per grid step.

    x_ref:  (1, H*W, cin)               lane-packed NHWC input (also residual)
    w1_ref: (cin, planes)               1x1 conv, compute_dtype
    w2_ref: (3*planes, 3*planes)        3x3 conv; rows = (kw, ci), cols = (kh, co)
    w3_ref: (planes, cout)              1x1 conv, compute_dtype
    s*/b*:  (1, C) f32                  folded BatchNorm scale / bias
    o_ref:  (1, H*W, cout)              lane-packed NHWC output
    """
    f32 = jnp.float32
    HW = H * W

    x2d = x_ref[0]                                    # (H*W, cin), input dtype
    xc = x2d.astype(compute_dtype)

    # ---- stage 1: 1x1 conv + BN + ReLU (f32 accumulate, f32 epilogue) ----
    o1 = jnp.dot(xc, w1_ref[...], preferred_element_type=f32)
    o1 = jnp.maximum(o1 * s1_ref[...] + b1_ref[...], 0.0)
    o1 = o1.astype(compute_dtype).reshape(H, W, planes)

    # ---- stage 2: 3x3 conv (stride 1, pad 1) + BN + ReLU ----
    # im2col-lite along W: p_cat[h, w, kw*planes + ci] = o1[h, w + kw - 1, ci]
    # (zero outside). One matmul with K = N = 3*planes; the kh row-shifts are
    # applied to the f32 output.
    zcol = jnp.zeros((H, 1, planes), compute_dtype)
    p_cat = jnp.concatenate(
        [jnp.concatenate([zcol, o1[:, :W - 1, :]], axis=1),   # kw=0 -> col w-1
         o1,                                                  # kw=1 -> col w
         jnp.concatenate([o1[:, 1:, :], zcol], axis=1)],      # kw=2 -> col w+1
        axis=-1)                                              # (H, W, 3*planes)

    y2 = jnp.dot(p_cat.reshape(HW, 3 * planes), w2_ref[...],
                 preferred_element_type=f32).reshape(H, W, 3 * planes)

    zrow = jnp.zeros((1, W, planes), f32)
    o2 = (jnp.concatenate([zrow, y2[:H - 1, :, 0:planes]], axis=0)       # kh=0
          + y2[:, :, planes:2 * planes]                                  # kh=1
          + jnp.concatenate([y2[1:, :, 2 * planes:], zrow], axis=0))     # kh=2
    o2 = o2.reshape(HW, planes)
    o2 = jnp.maximum(o2 * s2_ref[...] + b2_ref[...], 0.0)

    # ---- stage 3: 1x1 conv + BN + residual add + ReLU ----
    y = jnp.dot(o2.astype(compute_dtype), w3_ref[...], preferred_element_type=f32)
    y = jnp.maximum(y * s3_ref[...] + b3_ref[...] + x2d.astype(f32), 0.0)
    o_ref[0] = y.astype(o_ref.dtype)


# -------------------------------- wrappers ---------------------------------- #

def _vmem_capacity_bytes():
    try:
        return int(pltpu.get_tpu_info().vmem_capacity_bytes)
    except Exception:
        return 64 << 20   # conservative (v7x per-TC)


def bottleneck_forward_nhwc(x_nhwc, p, compute_dtype=jnp.bfloat16):
    """Fused Bottleneck (stride=1, downsample=None) on NHWC input."""
    N, H, W, cin = x_nhwc.shape
    planes = p["w1"].shape[1]
    cout = p["w3"].shape[1]
    assert cin == cout, "downsample=None requires inplanes == planes * expansion"

    f32 = jnp.float32
    x_packed = x_nhwc.reshape(N, H * W, cin)                  # free, keeps dtype

    # Pre-cast weights once (no per-step casts, half the weight DMA in bf16).
    w1 = p["w1"].astype(compute_dtype)
    # w2big[kw*planes + ci, kh*planes + co] = w2[kh, kw, ci, co]
    w2big = jnp.transpose(p["w2"], (1, 2, 0, 3)).reshape(
        3 * planes, 3 * planes).astype(compute_dtype)
    w3 = p["w3"].astype(compute_dtype)
    s1, b1 = p["s1"].astype(f32), p["b1"].astype(f32)
    s2, b2 = p["s2"].astype(f32), p["b2"].astype(f32)
    s3, b3 = p["s3"].astype(f32), p["b3"].astype(f32)

    kernel = functools.partial(
        _bottleneck_kernel, H=H, W=W, cin=cin, planes=planes, cout=cout,
        compute_dtype=compute_dtype)

    # ---- VMEM budget (per grid step) ----
    bx = jnp.dtype(x_nhwc.dtype).itemsize
    bc = jnp.dtype(compute_dtype).itemsize
    wbytes = ((cin * planes + 9 * planes * planes + planes * cout) * bc
              + (4 * planes + 2 * cout) * 4)
    io = 2 * 2 * H * W * (cin + cout) * bx                    # double-buffered I/O
    inter = H * W * (cin * 4 + planes * bc + 3 * planes * bc
                     + 3 * planes * 4 + planes * 4 + cout * 4)
    needed = io + 2 * wbytes + inter
    cap = max(32 << 20, min(100 << 20, (_vmem_capacity_bytes() * 3) // 4))
    vmem_limit = int(min(max(2 * needed, 32 << 20), cap))

    flops = 2 * N * H * W * (cin * planes + 9 * planes * planes + planes * cout)
    bytes_accessed = N * H * W * (cin + cout) * bx + wbytes
    cost = pl.CostEstimate(flops=int(flops), transcendentals=0,
                           bytes_accessed=int(bytes_accessed))

    out = pl.pallas_call(
        kernel,
        out_shape=jax.ShapeDtypeStruct((N, H * W, cout), x_nhwc.dtype),
        grid=(N,),
        in_specs=[
            pl.BlockSpec((1, H * W, cin), lambda n: (n, 0, 0)),          # x
            pl.BlockSpec((cin, planes), lambda n: (0, 0)),               # w1
            pl.BlockSpec((1, planes), lambda n: (0, 0)),                 # s1
            pl.BlockSpec((1, planes), lambda n: (0, 0)),                 # b1
            pl.BlockSpec((3 * planes, 3 * planes), lambda n: (0, 0)),    # w2 folded
            pl.BlockSpec((1, planes), lambda n: (0, 0)),                 # s2
            pl.BlockSpec((1, planes), lambda n: (0, 0)),                 # b2
            pl.BlockSpec((planes, cout), lambda n: (0, 0)),              # w3
            pl.BlockSpec((1, cout), lambda n: (0, 0)),                   # s3
            pl.BlockSpec((1, cout), lambda n: (0, 0)),                   # b3
        ],
        out_specs=pl.BlockSpec((1, H * W, cout), lambda n: (n, 0, 0)),
        compiler_params=pltpu.CompilerParams(
            dimension_semantics=("parallel",),
            vmem_limit_bytes=vmem_limit),
        cost_estimate=cost,
    )(x_packed, w1, s1, b1, w2big, s2, b2, w3, s3, b3)

    return out.reshape(N, H, W, cout)


def bottleneck_forward(x_nchw, p, compute_dtype=jnp.bfloat16):
    """NCHW wrapper for PyTorch parity. For a stack of blocks, keep NHWC
    end-to-end (bottleneck_forward_nhwc) and amortize the transposes at the
    network boundary."""
    x = jnp.transpose(x_nchw, (0, 2, 3, 1))
    o = bottleneck_forward_nhwc(x, p, compute_dtype=compute_dtype)
    return jnp.transpose(o, (0, 3, 1, 2))


# --------------------------- params & reference ----------------------------- #

def make_params(key, inplanes, planes):
    cout = planes * EXPANSION
    ks = jax.random.split(key, 12)

    def fold_bn(gamma, beta, mean, var):
        scale = gamma / jnp.sqrt(var + BN_EPS)
        bias = beta - mean * scale
        return scale.reshape(1, -1), bias.reshape(1, -1)

    w1 = 0.1 * jax.random.normal(ks[0], (inplanes, planes), jnp.float32)
    w2 = 0.1 * jax.random.normal(ks[1], (3, 3, planes, planes), jnp.float32)  # HWIO
    w3 = 0.1 * jax.random.normal(ks[2], (planes, cout), jnp.float32)

    s1, b1 = fold_bn(1.0 + 0.1 * jax.random.normal(ks[3], (planes,)),
                     0.1 * jax.random.normal(ks[4], (planes,)),
                     0.1 * jax.random.normal(ks[5], (planes,)),
                     0.5 + jax.random.uniform(ks[6], (planes,)))
    s2, b2 = fold_bn(1.0 + 0.1 * jax.random.normal(ks[7], (planes,)),
                     0.1 * jax.random.normal(ks[8], (planes,)),
                     0.1 * jax.random.normal(ks[9], (planes,)),
                     0.5 + jax.random.uniform(ks[10], (planes,)))
    s3, b3 = fold_bn(jnp.ones((cout,)), jnp.zeros((cout,)),
                     0.1 * jax.random.normal(ks[11], (cout,)),
                     jnp.ones((cout,)))
    return dict(w1=w1, w2=w2, w3=w3, s1=s1, b1=b1, s2=s2, b2=b2, s3=s3, b3=b3)


def bottleneck_reference(x_nchw, p):
    """Pure-JAX reference (lax conv) for correctness check."""
    x = jnp.transpose(x_nchw, (0, 2, 3, 1)).astype(jnp.float32)
    dn = ("NHWC", "HWIO", "NHWC")

    def conv(inp, w_hwio, pad):
        return jax.lax.conv_general_dilated(inp, w_hwio, (1, 1), pad,
                                            dimension_numbers=dn)

    def bn(inp, s, b):
        return inp * s.reshape(1, 1, 1, -1) + b.reshape(1, 1, 1, -1)

    cin, planes = p["w1"].shape
    cout = p["w3"].shape[1]
    o = jax.nn.relu(bn(conv(x, p["w1"].reshape(1, 1, cin, planes), "VALID"),
                       p["s1"], p["b1"]))
    o = jax.nn.relu(bn(conv(o, p["w2"], "SAME"), p["s2"], p["b2"]))
    o = bn(conv(o, p["w3"].reshape(1, 1, planes, cout), "VALID"),
           p["s3"], p["b3"]) + x
    o = jax.nn.relu(o)
    return jnp.transpose(o, (0, 3, 1, 2))


# ------------------------------------ main ----------------------------------- #

if __name__ == "__main__":
    planes = 4
    inplanes = planes * EXPANSION  # 16 -> residual add valid without downsample
    N, H, W = 2, 16, 16

    key = jax.random.PRNGKey(0)
    kx, kp = jax.random.split(key)
    x = jax.random.normal(kx, (N, inplanes, H, W), jnp.float32)  # NCHW like PyTorch
    params = make_params(kp, inplanes, planes)

    ref = jax.block_until_ready(bottleneck_reference(x, params))

    # f32 compute path: tight tolerance validates conv/BN/residual structure.
    out_f32 = jax.block_until_ready(
        bottleneck_forward(x, params, compute_dtype=jnp.float32))
    assert out_f32.shape == (N, planes * EXPANSION, H, W), out_f32.shape
    err_f32 = float(jnp.max(jnp.abs(out_f32 - ref)))
    assert jnp.allclose(out_f32, ref, atol=1e-4, rtol=1e-4), \
        f"f32 path max abs diff {err_f32}"

    # Default bf16 compute path (production): loosened tolerance.
    out_bf16 = jax.block_until_ready(bottleneck_forward(x, params))
    err_bf16 = float(jnp.max(jnp.abs(out_bf16 - ref)))
    assert jnp.allclose(out_bf16, ref, atol=5e-2, rtol=5e-2), \
        f"bf16 path max abs diff {err_bf16}"

    print("KERNEL_OK")
</pallas_src>

<mosaic_0001>
module attributes {stable_mosaic.version = 11 : i64} {
  func.func @_bottleneck_kernel(%arg0: i32, %arg1: memref<1x256x16xf32, #tpu.memory_space<vmem>>, %arg2: memref<16x4xf32, #tpu.memory_space<vmem>>, %arg3: memref<1x4xf32, #tpu.memory_space<vmem>>, %arg4: memref<1x4xf32, #tpu.memory_space<vmem>>, %arg5: memref<12x12xf32, #tpu.memory_space<vmem>>, %arg6: memref<1x4xf32, #tpu.memory_space<vmem>>, %arg7: memref<1x4xf32, #tpu.memory_space<vmem>>, %arg8: memref<4x16xf32, #tpu.memory_space<vmem>>, %arg9: memref<1x16xf32, #tpu.memory_space<vmem>>, %arg10: memref<1x16xf32, #tpu.memory_space<vmem>>, %arg11: memref<1x256x16xf32, #tpu.memory_space<vmem>>) attributes {dimension_semantics = [#tpu.dimension_semantics<parallel>], iteration_bounds = array<i64: 2>, scalar_prefetch = 0 : i64, scratch_operands = 0 : i64, tpu.core_type = #tpu.core_type<tc>, window_params = [{transform_indices = @transform_0, window_bounds = array<i64: 1, 256, 16>}, {pipeline_mode = #tpu.pipeline_mode<synchronous>, transform_indices = @transform_1, window_bounds = array<i64: 16, 4>}, {pipeline_mode = #tpu.pipeline_mode<synchronous>, transform_indices = @transform_2, window_bounds = array<i64: 1, 4>}, {pipeline_mode = #tpu.pipeline_mode<synchronous>, transform_indices = @transform_3, window_bounds = array<i64: 1, 4>}, {pipeline_mode = #tpu.pipeline_mode<synchronous>, transform_indices = @transform_4, window_bounds = array<i64: 12, 12>}, {pipeline_mode = #tpu.pipeline_mode<synchronous>, transform_indices = @transform_5, window_bounds = array<i64: 1, 4>}, {pipeline_mode = #tpu.pipeline_mode<synchronous>, transform_indices = @transform_6, window_bounds = array<i64: 1, 4>}, {pipeline_mode = #tpu.pipeline_mode<synchronous>, transform_indices = @transform_7, window_bounds = array<i64: 4, 16>}, {pipeline_mode = #tpu.pipeline_mode<synchronous>, transform_indices = @transform_8, window_bounds = array<i64: 1, 16>}, {pipeline_mode = #tpu.pipeline_mode<synchronous>, transform_indices = @transform_9, window_bounds = array<i64: 1, 16>}, {transform_indices = @transform_10, window_bounds = array<i64: 1, 256, 16>}]} {
    %c0 = arith.constant 0 : index
    %c0_0 = arith.constant 0 : index
    %c0_1 = arith.constant 0 : index
    %0 = vector.load %arg1[%c0, %c0_0, %c0_1] : memref<1x256x16xf32, #tpu.memory_space<vmem>>, vector<1x256x16xf32>
    %1 = vector.shape_cast %0 : vector<1x256x16xf32> to vector<256x16xf32>
    %c0_2 = arith.constant 0 : index
    %c0_3 = arith.constant 0 : index
    %2 = vector.load %arg2[%c0_2, %c0_3] : memref<16x4xf32, #tpu.memory_space<vmem>>, vector<16x4xf32>
    %cst = arith.constant dense<0.000000e+00> : vector<256x4xf32>
    %3 = tpu.matmul %1, %2, %cst {dimension_numbers = #tpu.dot_dimension_numbers<[1], [0], [0], [1], [0, 0, 1, 1], [], []>} : vector<256x16xf32>, vector<16x4xf32>, vector<256x4xf32> -> vector<256x4xf32>
    %c0_4 = arith.constant 0 : index
    %c0_5 = arith.constant 0 : index
    %4 = vector.load %arg3[%c0_4, %c0_5] : memref<1x4xf32, #tpu.memory_space<vmem>>, vector<1x4xf32>
    %5 = vector.broadcast %4 : vector<1x4xf32> to vector<256x4xf32>
    %6 = arith.mulf %3, %5 : vector<256x4xf32>
    %c0_6 = arith.constant 0 : index
    %c0_7 = arith.constant 0 : index
    %7 = vector.load %arg4[%c0_6, %c0_7] : memref<1x4xf32, #tpu.memory_space<vmem>>, vector<1x4xf32>
    %8 = vector.broadcast %7 : vector<1x4xf32> to vector<256x4xf32>
    %9 = arith.addf %6, %8 : vector<256x4xf32>
    %cst_8 = arith.constant 0.000000e+00 : f32
    %10 = vector.broadcast %cst_8 : f32 to vector<256x4xf32>
    %11 = arith.maximumf %9, %10 : vector<256x4xf32>
    %12 = vector.shape_cast %11 : vector<256x4xf32> to vector<16x16x4xf32>
    %cst_9 = arith.constant 0.000000e+00 : f32
    %13 = vector.broadcast %cst_9 : f32 to vector<16x1x4xf32>
    %14 = vector.extract_strided_slice %12 {offsets = [0, 0, 0], sizes = [16, 15, 4], strides = [1, 1, 1]} : vector<16x16x4xf32> to vector<16x15x4xf32>
    %15 = tpu.concatenate %13, %14 in 1 : vector<16x1x4xf32>, vector<16x15x4xf32> -> vector<16x16x4xf32>
    %16 = vector.extract_strided_slice %12 {offsets = [0, 1, 0], sizes = [16, 15, 4], strides = [1, 1, 1]} : vector<16x16x4xf32> to vector<16x15x4xf32>
    %17 = tpu.concatenate %16, %13 in 1 : vector<16x15x4xf32>, vector<16x1x4xf32> -> vector<16x16x4xf32>
    %18 = tpu.concatenate %15, %12, %17 in 2 : vector<16x16x4xf32>, vector<16x16x4xf32>, vector<16x16x4xf32> -> vector<16x16x12xf32>
    %19 = vector.shape_cast %18 : vector<16x16x12xf32> to vector<256x12xf32>
    %c0_10 = arith.constant 0 : index
    %c0_11 = arith.constant 0 : index
    %20 = vector.load %arg5[%c0_10, %c0_11] : memref<12x12xf32, #tpu.memory_space<vmem>>, vector<12x12xf32>
    %cst_12 = arith.constant dense<0.000000e+00> : vector<256x12xf32>
    %21 = tpu.matmul %19, %20, %cst_12 {dimension_numbers = #tpu.dot_dimension_numbers<[1], [0], [0], [1], [0, 0, 1, 1], [], []>} : vector<256x12xf32>, vector<12x12xf32>, vector<256x12xf32> -> vector<256x12xf32>
    %22 = vector.shape_cast %21 : vector<256x12xf32> to vector<16x16x12xf32>
    %cst_13 = arith.constant 0.000000e+00 : f32
    %23 = vector.broadcast %cst_13 : f32 to vector<1x16x4xf32>
    %24 = vector.extract_strided_slice %22 {offsets = [0, 0, 0], sizes = [15, 16, 4], strides = [1, 1, 1]} : vector<16x16x12xf32> to vector<15x16x4xf32>
    %25 = tpu.concatenate %23, %24 in 0 : vector<1x16x4xf32>, vector<15x16x4xf32> -> vector<16x16x4xf32>
    %26 = vector.extract_strided_slice %22 {offsets = [0, 0, 4], sizes = [16, 16, 4], strides = [1, 1, 1]} : vector<16x16x12xf32> to vector<16x16x4xf32>
    %27 = arith.addf %25, %26 : vector<16x16x4xf32>
    %28 = vector.extract_strided_slice %22 {offsets = [1, 0, 8], sizes = [15, 16, 4], strides = [1, 1, 1]} : vector<16x16x12xf32> to vector<15x16x4xf32>
    %29 = tpu.concatenate %28, %23 in 0 : vector<15x16x4xf32>, vector<1x16x4xf32> -> vector<16x16x4xf32>
    %30 = arith.addf %27, %29 : vector<16x16x4xf32>
    %31 = vector.shape_cast %30 : vector<16x16x4xf32> to vector<256x4xf32>
    %c0_14 = arith.constant 0 : index
    %c0_15 = arith.constant 0 : index
    %32 = vector.load %arg6[%c0_14, %c0_15] : memref<1x4xf32, #tpu.memory_space<vmem>>, vector<1x4xf32>
    %33 = vector.broadcast %32 : vector<1x4xf32> to vector<256x4xf32>
    %34 = arith.mulf %31, %33 : vector<256x4xf32>
    %c0_16 = arith.constant 0 : index
    %c0_17 = arith.constant 0 : index
    %35 = vector.load %arg7[%c0_16, %c0_17] : memref<1x4xf32, #tpu.memory_space<vmem>>, vector<1x4xf32>
    %36 = vector.broadcast %35 : vector<1x4xf32> to vector<256x4xf32>
    %37 = arith.addf %34, %36 : vector<256x4xf32>
    %cst_18 = arith.constant 0.000000e+00 : f32
    %38 = vector.broadcast %cst_18 : f32 to vector<256x4xf32>
    %39 = arith.maximumf %37, %38 : vector<256x4xf32>
    %c0_19 = arith.constant 0 : index
    %c0_20 = arith.constant 0 : index
    %40 = vector.load %arg8[%c0_19, %c0_20] : memref<4x16xf32, #tpu.memory_space<vmem>>, vector<4x16xf32>
    %cst_21 = arith.constant dense<0.000000e+00> : vector<256x16xf32>
    %41 = tpu.matmul %39, %40, %cst_21 {dimension_numbers = #tpu.dot_dimension_numbers<[1], [0], [0], [1], [0, 0, 1, 1], [], []>} : vector<256x4xf32>, vector<4x16xf32>, vector<256x16xf32> -> vector<256x16xf32>
    %c0_22 = arith.constant 0 : index
    %c0_23 = arith.constant 0 : index
    %42 = vector.load %arg9[%c0_22, %c0_23] : memref<1x16xf32, #tpu.memory_space<vmem>>, vector<1x16xf32>
    %43 = vector.broadcast %42 : vector<1x16xf32> to vector<256x16xf32>
    %44 = arith.mulf %41, %43 : vector<256x16xf32>
    %c0_24 = arith.constant 0 : index
    %c0_25 = arith.constant 0 : index
    %45 = vector.load %arg10[%c0_24, %c0_25] : memref<1x16xf32, #tpu.memory_space<vmem>>, vector<1x16xf32>
    %46 = vector.broadcast %45 : vector<1x16xf32> to vector<256x16xf32>
    %47 = arith.addf %44, %46 : vector<256x16xf32>
    %48 = arith.addf %47, %1 : vector<256x16xf32>
    %cst_26 = arith.constant 0.000000e+00 : f32
    %49 = vector.broadcast %cst_26 : f32 to vector<256x16xf32>
    %50 = arith.maximumf %48, %49 : vector<256x16xf32>
    %c0_27 = arith.constant 0 : index
    %c0_28 = arith.constant 0 : index
    %c0_29 = arith.constant 0 : index
    %51 = vector.load %arg11[%c0_27, %c0_28, %c0_29] : memref<1x256x16xf32, #tpu.memory_space<vmem>>, vector<1x256x16xf32>
    %52 = vector.shape_cast %51 : vector<1x256x16xf32> to vector<256x16xf32>
    %53 = vector.shape_cast %50 : vector<256x16xf32> to vector<1x256x16xf32>
    tpu.vector_store %arg11[%c0_27, %c0_28, %c0_29], %53 {strides = array<i32>} : memref<1x256x16xf32, #tpu.memory_space<vmem>>, vector<1x256x16xf32>,
    return
  }
  func.func @transform_0(%arg0: i32) -> (i32, i32, i32) {
    %c0_i32 = arith.constant 0 : i32
    %c0_i32_0 = arith.constant 0 : i32
    %c0_i32_1 = arith.constant 0 : i32
    return %arg0, %c0_i32, %c0_i32_0 : i32, i32, i32
  }
  func.func @transform_1(%arg0: i32) -> (i32, i32) {
    %c0_i32 = arith.constant 0 : i32
    %c0_i32_0 = arith.constant 0 : i32
    %c0_i32_1 = arith.constant 0 : i32
    return %c0_i32, %c0_i32_0 : i32, i32
  }
  func.func @transform_2(%arg0: i32) -> (i32, i32) {
    %c0_i32 = arith.constant 0 : i32
    %c0_i32_0 = arith.constant 0 : i32
    %c0_i32_1 = arith.constant 0 : i32
    return %c0_i32, %c0_i32_0 : i32, i32
  }
  func.func @transform_3(%arg0: i32) -> (i32, i32) {
    %c0_i32 = arith.constant 0 : i32
    %c0_i32_0 = arith.constant 0 : i32
    %c0_i32_1 = arith.constant 0 : i32
    return %c0_i32, %c0_i32_0 : i32, i32
  }
  func.func @transform_4(%arg0: i32) -> (i32, i32) {
    %c0_i32 = arith.constant 0 : i32
    %c0_i32_0 = arith.constant 0 : i32
    %c0_i32_1 = arith.constant 0 : i32
    return %c0_i32, %c0_i32_0 : i32, i32
  }
  func.func @transform_5(%arg0: i32) -> (i32, i32) {
    %c0_i32 = arith.constant 0 : i32
    %c0_i32_0 = arith.constant 0 : i32
    %c0_i32_1 = arith.constant 0 : i32
    return %c0_i32, %c0_i32_0 : i32, i32
  }
  func.func @transform_6(%arg0: i32) -> (i32, i32) {
    %c0_i32 = arith.constant 0 : i32
    %c0_i32_0 = arith.constant 0 : i32
    %c0_i32_1 = arith.constant 0 : i32
    return %c0_i32, %c0_i32_0 : i32, i32
  }
  func.func @transform_7(%arg0: i32) -> (i32, i32) {
    %c0_i32 = arith.constant 0 : i32
    %c0_i32_0 = arith.constant 0 : i32
    %c0_i32_1 = arith.constant 0 : i32
    return %c0_i32, %c0_i32_0 : i32, i32
  }
  func.func @transform_8(%arg0: i32) -> (i32, i32) {
    %c0_i32 = arith.constant 0 : i32
    %c0_i32_0 = arith.constant 0 : i32
    %c0_i32_1 = arith.constant 0 : i32
    return %c0_i32, %c0_i32_0 : i32, i32
  }
  func.func @transform_9(%arg0: i32) -> (i32, i32) {
    %c0_i32 = arith.constant 0 : i32
    %c0_i32_0 = arith.constant 0 : i32
    %c0_i32_1 = arith.constant 0 : i32
    return %c0_i32, %c0_i32_0 : i32, i32
  }
  func.func @transform_10(%arg0: i32) -> (i32, i32, i32) {
    %c0_i32 = arith.constant 0 : i32
    %c0_i32_0 = arith.constant 0 : i32
    %c0_i32_1 = arith.constant 0 : i32
    return %arg0, %c0_i32, %c0_i32_0 : i32, i32, i32
  }
}

</mosaic_0001>

<bundles_post_ra>
// kernel: tpu_custom_call.1
= control target key start
LH: loop header
LB: loop body
LE: loop exit
PB: predicated region body
PF: predicated region fallthrough
CT: control target
= control target key end

     0   :  { %s3077_s13 = smov 0   ;;  %s4347_s0 = inlined_call_operand.vmem [shape: f32[2,256,16], index: 0, kind: input, shape index: {}]   ;;  %s4348_s1 = inlined_call_operand.vmem [shape: f32[16,4], index: 1, kind: input, shape index: {}]   ;;  %s4349_s2 = inlined_call_operand.vmem [shape: f32[1,4], index: 2, kind: input, shape index: {}]   ;;  %s4350_s3 = inlined_call_operand.vmem [shape: f32[1,4], index: 3, kind: input, shape index: {}]   ;;  %s4351_s4 = inlined_call_operand.vmem [shape: f32[12,12], index: 4, kind: input, shape index: {}]   ;;  %s4352_s5 = inlined_call_operand.vmem [shape: f32[1,4], index: 5, kind: input, shape index: {}]   ;;  %s4353_s6 = inlined_call_operand.vmem [shape: f32[1,4], index: 6, kind: input, shape index: {}]   ;;  %s4354_s7 = inlined_call_operand.vmem [shape: f32[4,16], index: 7, kind: input, shape index: {}]   ;;  %s4355_s8 = inlined_call_operand.vmem [shape: f32[1,16], index: 8, kind: input, shape index: {}]   ;;  %s4356_s9 = inlined_call_operand.vmem [shape: f32[1,16], index: 9, kind: input, shape index: {}]   ;;  %s4357_s10 = inlined_call_operand.vmem [shape: f32[2,256,16], index: 10, kind: output, shape index: {}]  }
   0x1 LB: > { %s2588_s14 = sadd.s32 4294967295, %s3015_s13   ;;  %p2592_p0 = scmp.ge.s32.totalorder %s3015_s13, 1  ;;  %s3015_s13 = sphi %s3077_s13, %s20_s13  }
   0x2   : > { %p312_p1 = scmp.lt.s32.totalorder %s3015_s13, 3 }
   0x4   : > { %p313_p2 = pnand %p2592_p0, %p312_p1 }
   0x6   : > { %316 = sbr.rel (%p313_p2) target bundleno = 1021 (0x3fd), region = 60 }
   0xb   : > { %v393_v0 = vld [vmem:[%s4348_s1 + $0x8] sm:$0xff]  ;;  %v392_v1 = vld [vmem:[%s4348_s1] sm:$0xff]  ;;  %p350_p3 = scmp.lt.s32.totalorder %s2588_s14, 1  ;;  %vm394_vm0 = vcmask 130048   ;;  %vm1409_vm1 = vcmask 1043456   ;;  %s3017_s29 = smov 4  }
   0xc   : > { %2806 = vmatprep.subr.mxu0 %v393_v0  ;;  %2960 = vmatprep.subr.mxu1 %v393_v0  ;;  %v3168_v34 = vld [vmem:[%s4349_s2] ss:$0 sm:$0xff]  ;;  %v1311_v46 = vld [vmem:[%s4351_s4 + $0x8] sm:$0xf]  ;;  %vm955_vm2 = vcmask 1046528   ;;  %s3018_s30 = smov 8  }
   0xd   : > { %2807 = vmatpush3.msra.mxu0 %v393_v0  ;;  %2962 = vmatpush3.msra.mxu1 %v393_v0  ;;  %s4377_s14 = smov (!%p350_p3, %s2588_s14), 1  ;;  %v3173_v36 = vld [vmem:[%s4350_s3] ss:$0 sm:$0xff]  ;;  %vm858_vm3 = vcmask 1040384   ;;  %vm1244_vm4 = vcmask 31744   ;;  %vm1277_vm5 = vcmask 64512  }
   0xe   : > { %2808 = vmatprep.subr.mxu0 %v392_v1  ;;  %2961 = vmatprep.subr.mxu1 %v392_v1  ;;  %s2703_s19 = sshll.u32 %s4377_s14, 8  ;;  %vm1312_vm6 = vcmask 97280   ;;  %s3019_s15 = smov 124  }
   0xf   : > { %2809 = vmatpush3.msra.mxu0 %v392_v1  ;;  %2963 = vmatpush3.msra.mxu1 %v392_v1  ;;  %s3099_s22 = scalar_lea.vmem %s4347_s0, %s2703_s19  ;;  %s3020_s16 = smov 120  }
  0x10   : > { %v360_v2 = vld [vmem:[%s3099_s22] sm:$0xff]  ;;  %v361_v4 = vld [vmem:[%s3099_s22 + $0x8] sm:$0xff]  ;;  %v362_v6 = vld [vmem:[%s3099_s22 + $0x10] sm:$0xff]  ;;  %2858 = vmatprep.subr.msk.mxu1 %vm1409_vm1, %v1311_v46  ;;  %s4187_s11 = scalar_lea.vmem %s4357_s10, %s2703_s19 }
  0x11   : > { %v376_v3 = vld [vmem:[%s3099_s22 + $0x80] sm:$0xff]  ;;  %2810 = vmatprep.mubr.msk.f32.mxu0 %vm394_vm0, %v360_v2  ;;  %v377_v5 = vld [vmem:[%s3099_s22 + $0x88] sm:$0xff]  ;;  %v378_v7 = vld [vmem:[%s3099_s22 + $0x90] sm:$0xff] }
  0x12   : > { %2834 = vmatprep.mubr.msk.f32.mxu1 %vm394_vm0, %v376_v3  ;;  %2811 = vmatmul.mubr.msk.f32.vlgmr.msra.gmra.mxu0 %vm394_vm0, %v361_v4  ;;  %v363_v8 = vld [vmem:[%s3099_s22 + $0x18] sm:$0xff]  ;;  %v364_v10 = vld [vmem:[%s3099_s22 + $0x20] sm:$0xff]  ;;  %v365_v12 = vld [vmem:[%s3099_s22 + $0x28] sm:$0xff] }
  0x13   : > { %2835 = vmatmul.mubr.msk.f32.vlgmr.msra.gmra.mxu1 %vm394_vm0, %v377_v5  ;;  %2813 = vmatprep.mubr.msk.f32.mxu0 %vm394_vm0, %v362_v6  ;;  %v379_v9 = vld [vmem:[%s3099_s22 + $0x98] sm:$0xff]  ;;  %v380_v11 = vld [vmem:[%s3099_s22 + $0xa0] sm:$0xff]  ;;  %v381_v13 = vld [vmem:[%s3099_s22 + $0xa8] sm:$0xff] }
  0x14   : > { %2837 = vmatprep.mubr.msk.f32.mxu1 %vm394_vm0, %v378_v7  ;;  %v366_v14 = vld [vmem:[%s3099_s22 + $0x30] sm:$0xff]  ;;  %v367_v16 = vld [vmem:[%s3099_s22 + $0x38] sm:$0xff]  ;;  %v368_v18 = vld [vmem:[%s3099_s22 + $0x40] sm:$0xff]  ;;  %2859 = vmatpush3.msk.msra.mxu1 %vm1409_vm1, %v1311_v46 }
  0x15   : > { %v382_v15 = vld [vmem:[%s3099_s22 + $0xb0] sm:$0xff]  ;;  %v383_v17 = vld [vmem:[%s3099_s22 + $0xb8] sm:$0xff]  ;;  %v384_v19 = vld [vmem:[%s3099_s22 + $0xc0] sm:$0xff] }
  0x16   : > { %2814 = vmatmul.mubr.msk.f32.gmra.mxu0 %vm394_vm0, %v363_v8  ;;  %v369_v20 = vld [vmem:[%s3099_s22 + $0x48] sm:$0xff]  ;;  %v370_v22 = vld [vmem:[%s3099_s22 + $0x50] sm:$0xff]  ;;  %v371_v24 = vld [vmem:[%s3099_s22 + $0x58] sm:$0xff] }
  0x17   : > { %2838 = vmatmul.mubr.msk.f32.gmra.mxu1 %vm394_vm0, %v379_v9  ;;  %2816 = vmatprep.mubr.msk.f32.mxu0 %vm394_vm0, %v364_v10  ;;  %v385_v21 = vld [vmem:[%s3099_s22 + $0xc8] sm:$0xff]  ;;  %v386_v23 = vld [vmem:[%s3099_s22 + $0xd0] sm:$0xff]  ;;  %v387_v25 = vld [vmem:[%s3099_s22 + $0xd8] sm:$0xff] }
  0x18   : > { %2840 = vmatprep.mubr.msk.f32.mxu1 %vm394_vm0, %v380_v11  ;;  %v372_v26 = vld [vmem:[%s3099_s22 + $0x60] sm:$0xff]  ;;  %v373_v28 = vld [vmem:[%s3099_s22 + $0x68] sm:$0xff]  ;;  %v374_v30 = vld [vmem:[%s3099_s22 + $0x70] sm:$0xff] }
  0x19   : > { %v388_v27 = vld [vmem:[%s3099_s22 + $0xe0] sm:$0xff]  ;;  %v389_v29 = vld [vmem:[%s3099_s22 + $0xe8] sm:$0xff]  ;;  %v390_v31 = vld [vmem:[%s3099_s22 + $0xf0] sm:$0xff] }
  0x1a   : > { %2817 = vmatmul.mubr.msk.f32.gmra.mxu0 %vm394_vm0, %v365_v12  ;;  %v375_v32 = vld [vmem:[%s3099_s22 + $0x78] sm:$0xff] }
  0x1b   : > { %2841 = vmatmul.mubr.msk.f32.gmra.mxu1 %vm394_vm0, %v381_v13  ;;  %2819 = vmatprep.mubr.msk.f32.mxu0 %vm394_vm0, %v366_v14  ;;  %v391_v33 = vld [vmem:[%s3099_s22 + $0xf8] sm:$0xff]  ;;  %v1310_v13 = vld [vmem:[%s4351_s4] sm:$0xff] }
  0x1c   : > { %2843 = vmatprep.mubr.msk.f32.mxu1 %vm394_vm0, %v382_v15  ;;  %2860 = vmatprep.subr.mxu1 %v1310_v13 }
  0x1d   : > { %2861 = vmatpush3.msra.mxu1 %v1310_v13 }
  0x1e   : > { %2820 = vmatmul.mubr.msk.f32.gmra.mxu0 %vm394_vm0, %v367_v16 }
  0x1f   : > { %2844 = vmatmul.mubr.msk.f32.gmra.mxu1 %vm394_vm0, %v383_v17  ;;  %2822 = vmatprep.mubr.msk.f32.mxu0 %vm394_vm0, %v368_v18 }
  0x20   : > { %2846 = vmatprep.mubr.msk.f32.mxu1 %vm394_vm0, %v384_v19 }
  0x22   : > { %2823 = vmatmul.mubr.msk.f32.gmra.mxu0 %vm394_vm0, %v369_v20 }
  0x23   : > { %2847 = vmatmul.mubr.msk.f32.gmra.mxu1 %vm394_vm0, %v385_v21  ;;  %2825 = vmatprep.mubr.msk.f32.mxu0 %vm394_vm0, %v370_v22 }
  0x24   : > { %2849 = vmatprep.mubr.msk.f32.mxu1 %vm394_vm0, %v386_v23 }
  0x26   : > { %2826 = vmatmul.mubr.msk.f32.gmra.mxu0 %vm394_vm0, %v371_v24 }
  0x27   : > { %2850 = vmatmul.mubr.msk.f32.gmra.mxu1 %vm394_vm0, %v387_v25  ;;  %2828 = vmatprep.mubr.msk.f32.mxu0 %vm394_vm0, %v372_v26 }
  0x28   : > { %2852 = vmatprep.mubr.msk.f32.mxu1 %vm394_vm0, %v388_v27 }
  0x2a   : > { %2829 = vmatmul.mubr.msk.f32.gmra.mxu0 %vm394_vm0, %v373_v28 }
  0x2b   : > { %2853 = vmatmul.mubr.msk.f32.gmra.mxu1 %vm394_vm0, %v389_v29  ;;  %2831 = vmatprep.mubr.msk.f32.mxu0 %vm394_vm0, %v374_v30 }
  0x2c   : > { %2855 = vmatprep.mubr.msk.f32.mxu1 %vm394_vm0, %v390_v31 }
  0x2e   : > { %2832 = vmatmul.mubr.msk.f32.gmra.mxu0 %vm394_vm0, %v375_v32 }
  0x2f   : > { %2856 = vmatmul.mubr.msk.f32.gmra.mxu1 %vm394_vm0, %v391_v33 }
  0xd2   : > { %v2812_v35 = vpop.f32.mrf.mxu0 }
  0xd3   : > { %v2836_v37 = vpop.f32.mrf.mxu1  ;;  %v724_v38 = vmul.f32 %v2812_v35, %v3168_v34 }
  0xd4   : > { %v740_v39 = vmul.f32 %v2836_v37, %v3168_v34  ;;  %v557_v40 = vpop.f32.mrf.mxu0 }
  0xd5   : > { %v637_v41 = vpop.f32.mrf.mxu1  ;;  %v763_v42 = vadd.f32 %v3173_v36, %v724_v38  ;;  %v723_v44 = vmul.f32 %v3168_v34, %v557_v40 }
  0xd6   : > { %v779_v43 = vadd.f32 %v3173_v36, %v740_v39  ;;  %v739_v45 = vmul.f32 %v3168_v34, %v637_v41  ;;  %v2815_v47 = vpop.f32.mrf.mxu0 }
  0xd7   : > { %v2839_v48 = vpop.f32.mrf.mxu1  ;;  %v3184_v49 = vmax.f32 %v763_v42, 0.0  ;;  %v762_v51 = vadd.f32 %v3173_v36, %v723_v44  ;;  %v726_v55 = vmul.f32 %v2815_v47, %v3168_v34 }
  0xd8   : > { %v3186_v50 = vmax.f32 %v779_v43, 0.0  ;;  %v778_v52 = vadd.f32 %v3173_v36, %v739_v45  ;;  %v567_v53 = vpop.f32.mrf.mxu0  ;;  %v742_v60 = vmul.f32 %v2839_v48, %v3168_v34 }
  0xd9   : > { %v647_v54 = vpop.f32.mrf.mxu1  ;;  %1038 = vrot.lane.b32.xlu0 %v3184_v49, %s3017_s29  ;;  %v957_v56 = vrot.slane %v3184_v49, 1  ;;  %v3198_v59 = vmax.f32 %v762_v51, 0.0  ;;  %v725_v63 = vmul.f32 %v3168_v34, %v567_v53  ;;  %v765_v2 = vadd.f32 %v3173_v36, %v726_v55 }
  0xda   : > { %1070 = vrot.lane.b32.xlu1 %v3186_v50, %s3017_s29  ;;  %v2818_v57 = vpop.f32.mrf.mxu0  ;;  %v3201_v61 = vmax.f32 %v778_v52, 0.0  ;;  %v981_v0 = vrot.slane %v3186_v50, 1  ;;  %v741_v3 = vmul.f32 %v3168_v34, %v647_v54  ;;  %v781_v6 = vadd.f32 %v3173_v36, %v742_v60 }
  0xdb   : > { %v2842_v58 = vpop.f32.mrf.mxu1  ;;  %v1020_v62 = vsel %vm955_vm2, %v957_v56, 0.0  ;;  %v764_v7 = vadd.f32 %v3173_v36, %v725_v63  ;;  %v728_v10 = vmul.f32 %v2818_v57, %v3168_v34  ;;  %v3221_v14 = vmax.f32 %v765_v2, 0.0 }
  0xdc   : > { %v577_v1 = vpop.f32.mrf.mxu0  ;;  %v1028_v8 = vsel %vm955_vm2, %v981_v0, 0.0  ;;  %v980_v9 = vrot.slane %v3201_v61, 1  ;;  %v780_v15 = vadd.f32 %v3173_v36, %v741_v3  ;;  %v3227_v17 = vmax.f32 %v781_v6, 0.0 }
  0xdd   : > { %1036 = vrot.lane.b32.xlu0 %v3198_v59, %s3017_s29  ;;  %v657_v4 = vpop.f32.mrf.mxu1  ;;  %v727_v18 = vmul.f32 %v3168_v34, %v577_v1  ;;  %v3230_v19 = vmax.f32 %v764_v7, 0.0  ;;  %v956_v21 = vrot.slane %v3198_v59, 1  ;;  %v767_v22 = vadd.f32 %v3173_v36, %v728_v10 }
  0xde   : > { %1150 = vrot.lane.b32.xlu1 %v1020_v62, %s3018_s30  ;;  %v2821_v5 = vpop.f32.mrf.mxu0  ;;  %v982_v20 = vsel %vm955_vm2, %v980_v9, %v981_v0  ;;  %v744_v25 = vmul.f32 %v2842_v58, %v3168_v34  ;;  %v743_v26 = vmul.f32 %v3168_v34, %v657_v4  ;;  %v860_v27 = vrot.slane %v3184_v49, 7 }
  0xdf   : > { %v3216_v12 = vpop.f32.mrf.mxu1  ;;  %v884_v28 = vrot.slane %v3186_v50, 7  ;;  %v4358_v29 = vrot.slane %v3198_v59, 7  ;;  %v3243_v30 = vmax.f32 %v780_v15, 0.0  ;;  %v883_v33 = vrot.slane %v3201_v61, 7 }
  0xe0   : > { %v587_v11 = vpop.f32.mrf.mxu0  ;;  %v863_v35 = vrot.slane %v3221_v14, 7  ;;  %v766_v37 = vadd.f32 %v3173_v36, %v727_v18  ;;  %v960_v38 = vrot.slane %v3221_v14, 1  ;;  %v958_v40 = vsel %vm955_vm2, %v956_v21, %v957_v56 }
  0xe1   : > { %1068 = vrot.lane.b32.xlu0 %v3201_v61, %s3017_s29  ;;  %v667_v23 = vpop.f32.mrf.mxu1  ;;  %v3253_v41 = vmax.f32 %v767_v22, 0.0  ;;  %v959_v42 = vrot.slane %v3230_v19, 1  ;;  %v783_v44 = vadd.f32 %v3173_v36, %v744_v25  ;;  %v782_v45 = vadd.f32 %v3173_v36, %v743_v26 }
  0xe2   : > { %1182 = vrot.lane.b32.xlu1 %v1028_v8, %s3018_s30  ;;  %v2824_v16 = vpop.f32.mrf.mxu0  ;;  %v984_v46 = vrot.slane %v3227_v17, 1  ;;  %v730_v47 = vmul.f32 %v2821_v5, %v3168_v34  ;;  %v983_v48 = vrot.slane %v3243_v30, 1  ;;  %v729_v51 = vmul.f32 %v3168_v34, %v587_v11 }
  0xe3   : > { %v3245_v32 = vpop.f32.mrf.mxu1  ;;  %v732_v52 = vmul.f32 %v2824_v16, %v3168_v34  ;;  %v4360_v56 = vrot.slane %v3230_v19, 7  ;;  %v3270_v58 = vmax.f32 %v766_v37, 0.0  ;;  %v1021_v60 = vsel %vm955_vm2, %v960_v38, 0.0 }
  0xe4   : > { %v597_v24 = vpop.f32.mrf.mxu0  ;;  %v961_v63 = vsel %vm955_vm2, %v959_v42, %v960_v38  ;;  %v3282_v4 = vmax.f32 %v783_v44, 0.0  ;;  %v3284_v5 = vmax.f32 %v782_v45, 0.0  ;;  %v1029_v6 = vsel %vm955_vm2, %v984_v46, 0.0 }
  0xe5   : > { %1180 = vrot.lane.b32.xlu0 %v982_v20, %s3018_s30  ;;  %v731_v53 = vmul.f32 %v3168_v34, %v597_v24  ;;  %v677_v55 = vpop.f32.mrf.mxu1  ;;  %v771_v0 = vadd.f32 %v3173_v36, %v732_v52  ;;  %v769_v7 = vadd.f32 %v3173_v36, %v730_v47  ;;  %v985_v8 = vsel %vm955_vm2, %v983_v48, %v984_v46 }
  0xe6   : > { %1042 = vrot.lane.b32.xlu1 %v3221_v14, %s3017_s29  ;;  %v2827_v31 = vpop.f32.mrf.mxu0  ;;  %v768_v9 = vadd.f32 %v3173_v36, %v729_v51  ;;  %v963_v15 = vrot.slane %v3253_v41, 1  ;;  %v962_v16 = vrot.slane %v3270_v58, 1  ;;  %v746_v21 = vmul.f32 %v3216_v12, %v3168_v34 }
  0xe7   : > { %v770_v1 = vadd.f32 %v3173_v36, %v731_v53  ;;  %v3277_v3 = vpop.f32.mrf.mxu1  ;;  %v3290_v10 = vmax.f32 %v771_v0, 0.0  ;;  %v734_v18 = vmul.f32 %v2827_v31, %v3168_v34  ;;  %v745_v22 = vmul.f32 %v3168_v34, %v667_v23 }
  0xe8   : > { %v607_v43 = vpop.f32.mrf.mxu0  ;;  %v3305_v38 = vmax.f32 %v769_v7, 0.0  ;;  %v3324_v52 = vmax.f32 %v768_v9, 0.0  ;;  %v3451_v50 = vsel %vm858_vm3, %v4358_v29, %v860_v27  ;;  %v3465_v27 = vsel %vm858_vm3, 0.0, %v883_v33 }
  0xe9   : > { %1040 = vrot.lane.b32.xlu0 %v3230_v19, %s3017_s29  ;;  %v3292_v11 = vmax.f32 %v770_v1, 0.0  ;;  %v733_v20 = vmul.f32 %v3168_v34, %v607_v43  ;;  %v969_v24 = vrot.slane %v3290_v10, 1  ;;  %v687_v37 = vpop.f32.mrf.mxu1  ;;  %v773_v31 = vadd.f32 %v3173_v36, %v734_v18 }
  0xea   : > { %1074 = vrot.lane.b32.xlu1 %v3227_v17, %s3017_s29  ;;  %v2830_v54 = vpop.f32.mrf.mxu0 }
  0xeb   : > { %v968_v25 = vrot.slane %v3292_v11, 1  ;;  %v736_v12 = vmul.f32 %v2830_v54, %v3168_v34  ;;  %v3311_v23 = vsel %vm955_vm2, %v969_v24, 0.0  ;;  %v2854_v45 = vpop.f32.mrf.mxu1  ;;  %v3318_v46 = vmax.f32 %v773_v31, 0.0 }
  0xec   : > { %v617_v2 = vpop.f32.mrf.mxu0 }
  0xed   : > { %1072 = vrot.lane.b32.xlu0 %v3243_v30, %s3017_s29  ;;  %v3314_v42 = vsel %vm955_vm2, %v968_v25, %v969_v24  ;;  %v735_v43 = vmul.f32 %v3168_v34, %v617_v2  ;;  %v775_v48 = vadd.f32 %v3173_v36, %v736_v12  ;;  %v972_v1 = vrot.slane %v3318_v46, 1  ;;  %v697_v18 = vpop.f32.mrf.mxu1 }
  0xee   : > { %1148 = vrot.lane.b32.xlu1 %v958_v40, %s3018_s30  ;;  %v2833_v13 = vpop.f32.mrf.mxu0  ;;  %v772_v40 = vadd.f32 %v3173_v36, %v733_v20  ;;  %v747_v2 = vmul.f32 %v3168_v34, %v677_v55  ;;  %v785_v55 = vadd.f32 %v3173_v36, %v746_v21  ;;  %v784_v25 = vadd.f32 %v3173_v36, %v745_v22 }
  0xef   : > { %v738_v44 = vmul.f32 %v2833_v13, %v3168_v34  ;;  %v774_v53 = vadd.f32 %v3173_v36, %v735_v43  ;;  %v3333_v0 = vmax.f32 %v775_v48, 0.0  ;;  %v987_v12 = vrot.slane %v3282_v4, 1 }
  0xf0   : > { %v627_v26 = vpop.f32.mrf.mxu0  ;;  %v3320_v47 = vmax.f32 %v772_v40, 0.0  ;;  %v2857_v40 = vpop.f32.mrf.mxu1  ;;  %v786_v22 = vadd.f32 %v3173_v36, %v747_v2  ;;  %v750_v48 = vmul.f32 %v3277_v3, %v3168_v34 }
  0xf1   : > { %1152 = vrot.lane.b32.xlu0 %v961_v63, %s3018_s30  ;;  %v737_v51 = vmul.f32 %v3168_v34, %v627_v26  ;;  %v777_v54 = vadd.f32 %v3173_v36, %v738_v44  ;;  %v1022_v63 = vsel %vm955_vm2, %v963_v15, 0.0  ;;  %v3337_v7 = vmax.f32 %v774_v53, 0.0 }
  0xf2   : > { %1154 = vrot.lane.b32.xlu1 %v1021_v60, %s3018_s30  ;;  %v748_v60 = vmul.f32 %v3245_v32, %v3168_v34  ;;  %v971_v9 = vrot.slane %v3320_v47, 1  ;;  %v975_v20 = vrot.slane %v3333_v0, 1  ;;  %v707_v3 = vpop.f32.mrf.mxu1 }
  0xf3   : > { %v3340_v13 = vmax.f32 %v777_v54, 0.0  ;;  %v776_v32 = vadd.f32 %v3173_v36, %v737_v51  ;;  %v986_v51 = vrot.slane %v3284_v5, 1  ;;  %v3376_v54 = vmax.f32 %v786_v22, 0.0 }
  0xf4   : > { %v787_v24 = vadd.f32 %v3173_v36, %v748_v60  ;;  %v3352_v26 = vsel %vm955_vm2, %v971_v9, %v972_v1  ;;  %v749_v60 = vmul.f32 %v3168_v34, %v687_v37  ;;  %v789_v9 = vadd.f32 %v3173_v36, %v750_v48 }
  0xf5   : > { %1184 = vrot.lane.b32.xlu0 %v985_v8, %s3018_s30  ;;  %v3345_v8 = vsel %vm955_vm2, %v972_v1, 0.0  ;;  %v3354_v31 = vmax.f32 %v776_v32, 0.0  ;;  %v978_v43 = vrot.slane %v3340_v13, 1  ;;  %v754_v48 = vmul.f32 %v2857_v40, %v3168_v34 }
  0xf6   : > { %1186 = vrot.lane.b32.xlu1 %v1029_v6, %s3018_s30  ;;  %v964_v6 = vsel %vm955_vm2, %v962_v16, %v963_v15  ;;  %v3361_v15 = vsel %vm955_vm2, %v975_v20, 0.0  ;;  %v974_v16 = vrot.slane %v3337_v7, 1  ;;  %v3364_v21 = vmax.f32 %v787_v24, 0.0 }
  0xf7   : > { %v977_v44 = vrot.slane %v3354_v31, 1  ;;  %v3380_v1 = vsel %vm955_vm2, %v978_v43, 0.0  ;;  %v788_v37 = vadd.f32 %v3173_v36, %v749_v60  ;;  %v992_v24 = vrot.slane %v3376_v54, 1 }
  0xf8   : > { %v3374_v53 = vsel %vm955_vm2, %v974_v16, %v975_v20  ;;  %v993_v32 = vrot.slane %v3364_v21, 1  ;;  %v3391_v20 = vmax.f32 %v785_v55, 0.0  ;;  %v752_v16 = vmul.f32 %v2854_v45, %v3168_v34 }
  0xf9   : > { %1044 = vrot.lane.b32.xlu0 %v3270_v58, %s3017_s29  ;;  %v3383_v2 = vsel %vm955_vm2, %v977_v44, %v978_v43  ;;  %v3396_v22 = vmax.f32 %v789_v9, 0.0  ;;  %v751_v44 = vmul.f32 %v3168_v34, %v697_v18  ;;  %v3403_v62 = vmax.f32 %v788_v37, 0.0 }
  0xfa   : > { %1046 = vrot.lane.b32.xlu1 %v3253_v41, %s3017_s29  ;;  %v3399_v43 = vsel %vm955_vm2, %v993_v32, 0.0  ;;  %v3406_v55 = vsel %vm955_vm2, %v992_v24, %v993_v32  ;;  %v3409_v60 = vadd.f32 %v3173_v36, %v752_v16  ;;  %v753_v57 = vmul.f32 %v3168_v34, %v707_v3 }
  0xfb   : > { %v3412_v45 = vmax.f32 %v784_v25, 0.0  ;;  %v3415_v9 = vadd.f32 %v3173_v36, %v751_v44  ;;  %v4359_v39 = vrot.slane %v3396_v22, 1  ;;  %v3419_v18 = vadd.f32 %v3173_v36, %v754_v48 }
  0xfc   : > { %v4361_v40 = vrot.slane %v3270_v58, 7  ;;  %v890_v32 = vrot.slane %v3282_v4, 7  ;;  %v995_v34 = vrot.slane %v3403_v62, 1  ;;  %v3427_v25 = vadd.f32 %v3173_v36, %v753_v57 }
  0xfd   : > { %1076 = vrot.lane.b32.xlu0 %v3284_v5, %s3017_s29  ;;  %v889_v3 = vrot.slane %v3284_v5, 7  ;;  %v869_v37 = vrot.slane %v3305_v38, 7  ;;  %v4362_v24 = vrot.slane %v3324_v52, 7  ;;  %v893_v57 = vrot.slane %v3391_v20, 7 }
  0xfe   : > { %1078 = vrot.lane.b32.xlu1 %v3282_v4, %s3017_s29  ;;  %v3437_v4 = vsel %vm858_vm3, %v883_v33, %v884_v28  ;;  %v3444_v36 = vsel %vm955_vm2, %v995_v34, %v4359_v39  ;;  %v892_v28 = vrot.slane %v3412_v45, 7  ;;  %v872_v5 = vrot.slane %v3290_v10, 7 }
  0xff   : > { %v878_v16 = vrot.slane %v3333_v0, 7  ;;  %v877_v44 = vrot.slane %v3337_v7, 7  ;;  %v881_v48 = vrot.slane %v3340_v13, 7  ;;  %v3474_v34 = vsel %vm858_vm3, %v4360_v56, %v863_v35 }
 0x100   : > { %v880_v33 = vrot.slane %v3354_v31, 7  ;;  %v896_v29 = vrot.slane %v3364_v21, 7  ;;  %v895_v39 = vrot.slane %v3376_v54, 7  ;;  %v899_v35 = vrot.slane %v3396_v22, 7 }
 0x101   : > { %1156 = vrot.lane.b32.xlu0 %v964_v6, %s3018_s30  ;;  %v988_v6 = vsel %vm955_vm2, %v986_v51, %v987_v12  ;;  %v875_v51 = vrot.slane %v3318_v46, 7  ;;  %v4366_v56 = vrot.slane %v3253_v41, 7  ;;  %v3513_v41 = vsel %vm858_vm3, %v4362_v24, %v869_v37 }
 0x102   : > { %1158 = vrot.lane.b32.xlu1 %v1022_v63, %s3018_s30  ;;  %v1030_v63 = vsel %vm955_vm2, %v987_v12, 0.0  ;;  %v871_v12 = vrot.slane %v3292_v11, 7  ;;  %v965_v37 = vrot.slane %v3324_v52, 1  ;;  %v3543_v24 = vsel %vm858_vm3, 0.0, %v880_v33 }
 0x105   : > { %1188 = vrot.lane.b32.xlu0 %v988_v6, %s3018_s30  ;;  %v4364_v6 = vrot.slane %v3243_v30, 7  ;;  %v3508_v30 = vsel %vm858_vm3, 0.0, %v889_v3 }
 0x106   : > { %1190 = vrot.lane.b32.xlu1 %v1030_v63, %s3018_s30  ;;  %v4363_v63 = vrot.slane %v3227_v17, 7  ;;  %v898_v17 = vrot.slane %v3403_v62, 7 }
 0x107   : > { %v4365_v14 = vmov %v4364_v6 }
 0x108   : > { %v3481_v61 = vsel %vm858_vm3, %v4364_v6, %v4363_v63  ;;  %v3489_v49 = vsel %vm858_vm3, 0.0, %v4365_v14  ;;  %v3498_v63 = vsel %vm858_vm3, %v4361_v40, %v4366_v56  ;;  %v3501_v6 = vsel %vm858_vm3, %v889_v3, %v890_v32 }
 0x109   : > { %4367 = vst [vmem:[#allocation2_spill] sm:$0xff] %v3501_v6  ;;  %1048 = vrot.lane.b32.xlu0 %v3324_v52, %s3017_s29  ;;  %v3516_v56 = vsel %vm858_vm3, %v892_v28, %v893_v57  ;;  %v966_v32 = vrot.slane %v3305_v38, 1  ;;  %v3520_v14 = vsel %vm858_vm3, 0.0, %v892_v28  ;;  %v3525_v40 = vsel %vm858_vm3, %v871_v12, %v872_v5 }
 0x10a   : > { %1050 = vrot.lane.b32.xlu1 %v3305_v38, %s3017_s29  ;;  %v4368_v3 = vrot.slane %v3320_v47, 7  ;;  %v3534_v57 = vsel %vm858_vm3, %v877_v44, %v878_v16  ;;  %v3537_v38 = vsel %vm858_vm3, 0.0, %v877_v44  ;;  %v3540_v28 = vsel %vm858_vm3, %v880_v33, %v881_v48 }
 0x10b   : > { %v3546_v5 = vsel %vm858_vm3, %v895_v39, %v896_v29  ;;  %v3559_v16 = vsel %vm858_vm3, 0.0, %v898_v17  ;;  %v1023_v44 = vsel %vm955_vm2, %v966_v32, 0.0  ;;  %v967_v29 = vsel %vm955_vm2, %v965_v37, %v966_v32 }
 0x10c   : > { %v3530_v6 = vsel %vm858_vm3, %v4368_v3, %v875_v51  ;;  %v3549_v51 = vsel %vm858_vm3, 0.0, %v895_v39  ;;  %v3552_v3 = vsel %vm858_vm3, %v898_v17, %v899_v35  ;;  %v990_v48 = vrot.slane %v3391_v20, 1 }
 0x10d   : > { %1080 = vrot.lane.b32.xlu0 %v3412_v45, %s3017_s29  ;;  %v989_v39 = vrot.slane %v3412_v45, 1 }
 0x10e   : > { %1082 = vrot.lane.b32.xlu1 %v3391_v20, %s3017_s29  ;;  %v1031_v33 = vsel %vm955_vm2, %v990_v48, 0.0 }
 0x10f   : > { %v991_v35 = vsel %vm955_vm2, %v989_v39, %v990_v48  ;;  %v4371_v48 = vrot.slane %v3230_v19, 7 }
 0x111   : > { %1160 = vrot.lane.b32.xlu0 %v967_v29, %s3018_s30 }
 0x112   : > { %1162 = vrot.lane.b32.xlu1 %v1023_v44, %s3018_s30 }
 0x115   : > { %1192 = vrot.lane.b32.xlu0 %v991_v35, %s3018_s30 }
 0x116   : > { %1194 = vrot.lane.b32.xlu1 %v1031_v33, %s3018_s30 }
 0x119   : > { %1052 = vrot.lane.b32.xlu0 %v3292_v11, %s3017_s29  ;;  %v4374_v11 = vrot.slane %v3320_v47, 7 }
 0x11a   : > { %1054 = vrot.lane.b32.xlu1 %v3290_v10, %s3017_s29  ;;  %v3616_v10 = vmax.f32 %v3409_v60, 0.0 }
 0x11d   : > { %1164 = vrot.lane.b32.xlu0 %v3314_v42, %s3018_s30  ;;  %v4369_v42 = vrot.slane %v3396_v22, 1 }
 0x11e   : > { %1166 = vrot.lane.b32.xlu1 %v3311_v23, %s3018_s30  ;;  %v3619_v23 = vmax.f32 %v3415_v9, 0.0 }
 0x121   : > { %1056 = vrot.lane.b32.xlu0 %v3320_v47, %s3017_s29 }
 0x122   : > { %1058 = vrot.lane.b32.xlu1 %v3318_v46, %s3017_s29  ;;  %v1033_v46 = vsel %vm955_vm2, %v4369_v42, 0.0 }
 0x125   : > { %1168 = vrot.lane.b32.xlu0 %v3352_v26, %s3018_s30 }
 0x126   : > { %1170 = vrot.lane.b32.xlu1 %v3345_v8, %s3018_s30 }
 0x129   : > { %1060 = vrot.lane.b32.xlu0 %v3337_v7, %s3017_s29  ;;  %v998_v7 = vrot.slane %v3619_v23, 1 }
 0x12a   : > { %1062 = vrot.lane.b32.xlu1 %v3333_v0, %s3017_s29  ;;  %v999_v0 = vrot.slane %v3616_v10, 1 }
 0x12c   : > { %v1034_v8 = vsel %vm955_vm2, %v999_v0, 0.0  ;;  %v1000_v26 = vsel %vm955_vm2, %v998_v7, %v999_v0 }
 0x12d   : > { %1172 = vrot.lane.b32.xlu0 %v3374_v53, %s3018_s30 }
 0x12e   : > { %1174 = vrot.lane.b32.xlu1 %v3361_v15, %s3018_s30 }
 0x131   : > { %1064 = vrot.lane.b32.xlu0 %v3354_v31, %s3017_s29 }
 0x132   : > { %1066 = vrot.lane.b32.xlu1 %v3340_v13, %s3017_s29  ;;  %v3637_v13 = vmax.f32 %v3427_v25, 0.0 }
 0x134   : > { %v1001_v53 = vrot.slane %v3637_v13, 1 }
 0x135   : > { %1176 = vrot.lane.b32.xlu0 %v3383_v2, %s3018_s30 }
 0x136   : > { %1178 = vrot.lane.b32.xlu1 %v3380_v1, %s3018_s30 }
 0x139   : > { %1084 = vrot.lane.b32.xlu0 %v3376_v54, %s3017_s29 }
 0x13a   : > { %1086 = vrot.lane.b32.xlu1 %v3364_v21, %s3017_s29 }
 0x13d   : > { %1196 = vrot.lane.b32.xlu0 %v3406_v55, %s3018_s30 }
 0x13e   : > { %1198 = vrot.lane.b32.xlu1 %v3399_v43, %s3018_s30 }
 0x141   : > { %1088 = vrot.lane.b32.xlu0 %v3403_v62, %s3017_s29  ;;  %v3634_v62 = vmax.f32 %v3419_v18, 0.0  ;;  %v4370_v18 = vrot.slane %v3198_v59, 7  ;;  %v940_v59 = vsel %vm858_vm3, 0.0, %v4371_v48 }
 0x142   : > { %1090 = vrot.lane.b32.xlu1 %v3396_v22, %s3017_s29 }
 0x143   : > { %v1002_v21 = vrot.slane %v3634_v62, 1  ;;  %v939_v25 = vsel %vm858_vm3, 0.0, %v4370_v18 }
 0x145   : > { %1200 = vrot.lane.b32.xlu0 %v3444_v36, %s3018_s30  ;;  %v1035_v2 = vsel %vm955_vm2, %v1002_v21, 0.0  ;;  %v1003_v20 = vsel %vm955_vm2, %v1001_v53, %v1002_v21 }
 0x146   : > { %1202 = vrot.lane.b32.xlu1 %v1033_v46, %s3018_s30 }
 0x149   : > { %1092 = vrot.lane.b32.xlu0 %v3619_v23, %s3017_s29 }
 0x14a   : > { %1094 = vrot.lane.b32.xlu1 %v3616_v10, %s3017_s29 }
 0x14b   : > { %v1039_v15 = vpop.permute.xlu0 %1038 }
 0x14c   : > { %v3641_v31 = vpop.permute.xlu1 %1070  ;;  %v1246_v37 = vsel %vm1244_vm4, %v3451_v50, %v1039_v15  ;;  %v4372_v15 = vrot.slane %v3270_v58, 7 }
 0x14d   : > { %1204 = vrot.lane.b32.xlu0 %v1000_v26, %s3018_s30 }
 0x14e   : > { %1206 = vrot.lane.b32.xlu1 %v1034_v8, %s3018_s30  ;;  %v941_v21 = vsel %vm858_vm3, 0.0, %v4372_v15 }
 0x14f   : > { %v1037_v1 = vpop.permute.xlu0 %1036 }
 0x150   : > { %v1151_v54 = vpop.permute.xlu1 %1150  ;;  %v1245_v36 = vsel %vm1244_vm4, %v939_v25, %v1037_v1 }
 0x151   : > { %1096 = vrot.lane.b32.xlu0 %v3637_v13, %s3017_s29  ;;  %v1279_v29 = vsel %vm1277_vm5, %v1246_v37, %v1151_v54 }
 0x152   : > { %1098 = vrot.lane.b32.xlu1 %v3634_v62, %s3017_s29 }
 0x153   : > { %v3655_v43 = vpop.permute.xlu0 %1068 }
 0x154   : > { %v3653_v22 = vpop.permute.xlu1 %1182 }
 0x155   : > { %1208 = vrot.lane.b32.xlu0 %v1003_v20, %s3018_s30 }
 0x156   : > { %1210 = vrot.lane.b32.xlu1 %v1035_v2, %s3018_s30 }
 0x157   : > { %v3659_v55 = vpop.permute.xlu0 %1180 }
 0x158   : > { %v1043_v60 = vpop.permute.xlu1 %1042 }
 0x159   : > { %v1248_v39 = vsel %vm1244_vm4, %v3474_v34, %v1043_v60 }
 0x15b   : > { %v1041_v9 = vpop.permute.xlu0 %1040 }
 0x15c   : > { %v3661_v45 = vpop.permute.xlu1 %1074  ;;  %v1247_v33 = vsel %vm1244_vm4, %v940_v59, %v1041_v9 }
 0x15f   : > { %v3667_v32 = vpop.permute.xlu0 %1072 }
 0x160   : > { %v1149_v17 = vpop.permute.xlu1 %1148 }
 0x161   : > { %v1278_v44 = vsel %vm1277_vm5, %v1245_v36, %v1149_v17  ;;  %v4373_v17 = vrot.slane %v3324_v52, 7 }
 0x162   : > { %2862 = vmatprep.mubr.msk.f32.mxu1 %vm1312_vm6, %v1278_v44 }
 0x163   : > { %2863 = vmatmul.mubr.msk.f32.vlgmr.msra.gmra.mxu1 %vm1312_vm6, %v1279_v29  ;;  %v1153_v42 = vpop.permute.xlu0 %1152  ;;  %v942_v37 = vsel %vm858_vm3, 0.0, %v4373_v17 }
 0x164   : > { %v1155_v35 = vpop.permute.xlu1 %1154  ;;  %v1280_v46 = vsel %vm1277_vm5, %v1247_v33, %v1153_v42 }
 0x165   : > { %v1281_v50 = vsel %vm1277_vm5, %v1248_v39, %v1155_v35  ;;  %2865 = vmatprep.mubr.msk.f32.mxu1 %vm1312_vm6, %v1280_v46 }
 0x167   : > { %2866 = vmatmul.mubr.msk.f32.gmra.mxu1 %vm1312_vm6, %v1281_v50  ;;  %v3687_v0 = vpop.permute.xlu0 %1184 }
 0x168   : > { %v3685_v19 = vpop.permute.xlu1 %1186 }
 0x16b   : > { %v1045_v8 = vpop.permute.xlu0 %1044 }
 0x16c   : > { %v1047_v7 = vpop.permute.xlu1 %1046  ;;  %v1249_v54 = vsel %vm1244_vm4, %v941_v21, %v1045_v8 }
 0x16d   : > { %v1250_v53 = vsel %vm1244_vm4, %v3498_v63, %v1047_v7 }
 0x16f   : > { %v3691_v34 = vpop.permute.xlu0 %1076 }
 0x170   : > { %v3689_v26 = vpop.permute.xlu1 %1078 }
 0x173   : > { %v1157_v2 = vpop.permute.xlu0 %1156 }
 0x174   : > { %v1159_v1 = vpop.permute.xlu1 %1158  ;;  %v1282_v60 = vsel %vm1277_vm5, %v1249_v54, %v1157_v2 }
 0x175   : > { %v1283_v20 = vsel %vm1277_vm5, %v1250_v53, %v1159_v1  ;;  %2868 = vmatprep.mubr.msk.f32.mxu1 %vm1312_vm6, %v1282_v60 }
 0x176   : > { %2869 = vmatmul.mubr.msk.f32.gmra.mxu1 %vm1312_vm6, %v1283_v20 }
 0x177   : > { %v3705_v58 = vpop.permute.xlu0 %1188 }
 0x178   : > { %v3703_v9 = vpop.permute.xlu1 %1190 }
 0x17b   : > { %v1049_v25 = vpop.permute.xlu0 %1048 }
 0x17c   : > { %v1051_v18 = vpop.permute.xlu1 %1050  ;;  %v1251_v29 = vsel %vm1244_vm4, %v942_v37, %v1049_v25 }
 0x17d   : > { %v1252_v44 = vsel %vm1244_vm4, %v3513_v41, %v1051_v18  ;;  %v943_v41 = vsel %vm858_vm3, 0.0, %v871_v12  ;;  %v944_v12 = vsel %vm858_vm3, 0.0, %v4374_v11  ;;  %v901_v11 = vrot.slane %v3619_v23, 7 }
 0x17f   : > { %v3709_v63 = vpop.permute.xlu0 %1080 }
 0x180   : > { %v3707_v36 = vpop.permute.xlu1 %1082 }
 0x183   : > { %v1161_v59 = vpop.permute.xlu0 %1160 }
 0x184   : > { %v1163_v48 = vpop.permute.xlu1 %1162  ;;  %v1284_v33 = vsel %vm1277_vm5, %v1251_v29, %v1161_v59 }
 0x185   : > { %v1285_v39 = vsel %vm1277_vm5, %v1252_v44, %v1163_v48  ;;  %2871 = vmatprep.mubr.msk.f32.mxu1 %vm1312_vm6, %v1284_v33 }
 0x186   : > { %2872 = vmatmul.mubr.msk.f32.gmra.mxu1 %vm1312_vm6, %v1285_v39 }
 0x187   : > { %v3723_v52 = vpop.permute.xlu0 %1192 }
 0x188   : > { %v3721_v35 = vpop.permute.xlu1 %1194 }
 0x18b   : > { %v1053_v50 = vpop.permute.xlu0 %1052 }
 0x18c   : > { %v1055_v42 = vpop.permute.xlu1 %1054  ;;  %v1253_v7 = vsel %vm1244_vm4, %v943_v41, %v1053_v50 }
 0x18d   : > { %v1254_v46 = vsel %vm1244_vm4, %v3525_v40, %v1055_v42 }
 0x18f   : > { %v1165_v15 = vpop.permute.xlu0 %1164 }
 0x190   : > { %v1167_v8 = vpop.permute.xlu1 %1166  ;;  %v1286_v53 = vsel %vm1277_vm5, %v1253_v7, %v1165_v15  ;;  %v1261_v7 = vsel %vm1244_vm4, %v3465_v27, %v3655_v43  ;;  %v1263_v27 = vsel %vm1244_vm4, %v3489_v49, %v3667_v32  ;;  %v1265_v49 = vsel %vm1244_vm4, %v3508_v30, %v3691_v34 }
 0x191   : > { %v1287_v21 = vsel %vm1277_vm5, %v1254_v46, %v1167_v8  ;;  %2874 = vmatprep.mubr.msk.f32.mxu1 %vm1312_vm6, %v1286_v53  ;;  %v1294_v8 = vsel %vm1277_vm5, %v1261_v7, %v3659_v55  ;;  %v1296_v43 = vsel %vm1277_vm5, %v1263_v27, %v3687_v0  ;;  %v1267_v30 = vsel %vm1244_vm4, %v3520_v14, %v3709_v63 }
 0x192   : > { %2875 = vmatmul.mubr.msk.f32.gmra.mxu1 %vm1312_vm6, %v1287_v21 }
 0x193   : > { %v1057_v1 = vpop.permute.xlu0 %1056 }
 0x194   : > { %v1059_v54 = vpop.permute.xlu1 %1058  ;;  %v1255_v2 = vsel %vm1244_vm4, %v944_v12, %v1057_v1 }
 0x195   : > { %v1256_v40 = vsel %vm1244_vm4, %v3530_v6, %v1059_v54  ;;  %v4375_v54 = vld [vmem:[#allocation2_spill] sm:$0xff] }
 0x197   : > { %v1169_v60 = vpop.permute.xlu0 %1168 }
 0x198   : > { %v1171_v20 = vpop.permute.xlu1 %1170  ;;  %v1288_v25 = vsel %vm1277_vm5, %v1255_v2, %v1169_v60 }
 0x199   : > { %v1289_v18 = vsel %vm1277_vm5, %v1256_v40, %v1171_v20  ;;  %2877 = vmatprep.mubr.msk.f32.mxu1 %vm1312_vm6, %v1288_v25 }
 0x19a   : > { %2878 = vmatmul.mubr.msk.f32.gmra.mxu1 %vm1312_vm6, %v1289_v18  ;;  %v904_v18 = vrot.slane %v3637_v13, 7 }
 0x19b   : > { %v1061_v37 = vpop.permute.xlu0 %1060 }
 0x19c   : > { %v1063_v17 = vpop.permute.xlu1 %1062  ;;  %v1257_v6 = vsel %vm1244_vm4, %v3537_v38, %v1061_v37 }
 0x19d   : > { %v1258_v47 = vsel %vm1244_vm4, %v3534_v57, %v1063_v17 }
 0x19f   : > { %v1173_v29 = vpop.permute.xlu0 %1172 }
 0x1a0   : > { %v1175_v44 = vpop.permute.xlu1 %1174  ;;  %v1290_v59 = vsel %vm1277_vm5, %v1257_v6, %v1173_v29 }
 0x1a1   : > { %v1291_v48 = vsel %vm1277_vm5, %v1258_v47, %v1175_v44  ;;  %2880 = vmatprep.mubr.msk.f32.mxu1 %vm1312_vm6, %v1290_v59 }
 0x1a2   : > { %2881 = vmatmul.mubr.msk.f32.gmra.mxu1 %vm1312_vm6, %v1291_v48 }
 0x1a3   : > { %v1065_v33 = vpop.permute.xlu0 %1064 }
 0x1a4   : > { %v1067_v39 = vpop.permute.xlu1 %1066  ;;  %v1259_v57 = vsel %vm1244_vm4, %v3543_v24, %v1065_v33  ;;  %v1262_v24 = vsel %vm1244_vm4, %v3437_v4, %v3641_v31  ;;  %v1264_v4 = vsel %vm1244_vm4, %v3481_v61, %v3661_v45  ;;  %v1266_v61 = vsel %vm1244_vm4, %v4375_v54, %v3689_v26 }
 0x1a5   : > { %v1260_v42 = vsel %vm1244_vm4, %v3540_v28, %v1067_v39  ;;  %v1295_v21 = vsel %vm1277_vm5, %v1262_v24, %v3653_v22  ;;  %v1297_v31 = vsel %vm1277_vm5, %v1264_v4, %v3685_v19  ;;  %v1298_v22 = vsel %vm1277_vm5, %v1265_v49, %v3705_v58 }
 0x1a6   : > { %v1299_v45 = vsel %vm1277_vm5, %v1266_v61, %v3703_v9  ;;  %v1300_v19 = vsel %vm1277_vm5, %v1267_v30, %v3723_v52  ;;  %v1268_v26 = vsel %vm1244_vm4, %v3516_v56, %v3707_v36 }
 0x1a7   : > { %v1177_v38 = vpop.permute.xlu0 %1176  ;;  %v1301_v9 = vsel %vm1277_vm5, %v1268_v26, %v3721_v35  ;;  %v902_v35 = vrot.slane %v3616_v10, 7 }
 0x1a8   : > { %v1179_v50 = vpop.permute.xlu1 %1178  ;;  %v1292_v46 = vsel %vm1277_vm5, %v1259_v57, %v1177_v38 }
 0x1a9   : > { %v1293_v41 = vsel %vm1277_vm5, %v1260_v42, %v1179_v50  ;;  %2883 = vmatprep.mubr.msk.f32.mxu1 %vm1312_vm6, %v1292_v46  ;;  %v903_v10 = vsel %vm858_vm3, %v901_v11, %v902_v35  ;;  %v2034_v50 = vld [vmem:[%s4354_s7] sm:$0xf] }
 0x1aa   : > { %2884 = vmatmul.mubr.msk.f32.gmra.mxu1 %vm1312_vm6, %v1293_v41  ;;  %2910 = vmatprep.subr.msk.mxu0 %vm1409_vm1, %v2034_v50 }
 0x1ab   : > { %v1085_v15 = vpop.permute.xlu0 %1084  ;;  %2886 = vmatprep.mubr.msk.f32.mxu1 %vm1312_vm6, %v1294_v8  ;;  %2911 = vmatpush3.msk.msra.mxu0 %vm1409_vm1, %v2034_v50 }
 0x1ac   : > { %v1087_v28 = vpop.permute.xlu1 %1086  ;;  %v1269_v1 = vsel %vm1244_vm4, %v3549_v51, %v1085_v15 }
 0x1ad   : > { %v1270_v12 = vsel %vm1244_vm4, %v3546_v5, %v1087_v28  ;;  %v953_v5 = vsel %vm858_vm3, 0.0, %v901_v11 }
 0x1ae   : > { %2887 = vmatmul.mubr.msk.f32.gmra.mxu1 %vm1312_vm6, %v1295_v21 }
 0x1af   : > { %v1197_v53 = vpop.permute.xlu0 %1196  ;;  %2889 = vmatprep.mubr.msk.f32.mxu1 %vm1312_vm6, %v1296_v43 }
 0x1b0   : > { %v1199_v55 = vpop.permute.xlu1 %1198  ;;  %v1302_v14 = vsel %vm1277_vm5, %v1269_v1, %v1197_v53 }
 0x1b1   : > { %v1303_v56 = vsel %vm1277_vm5, %v1270_v12, %v1199_v55 }
 0x1b2   : > { %2890 = vmatmul.mubr.msk.f32.gmra.mxu1 %vm1312_vm6, %v1297_v31 }
 0x1b3   : > { %v1089_v0 = vpop.permute.xlu0 %1088  ;;  %2892 = vmatprep.mubr.msk.f32.mxu1 %vm1312_vm6, %v1298_v22 }
 0x1b4   : > { %v1091_v32 = vpop.permute.xlu1 %1090  ;;  %v1271_v36 = vsel %vm1244_vm4, %v3559_v16, %v1089_v0  ;;  %v905_v16 = vrot.slane %v3634_v62, 7  ;;  %v954_v62 = vsel %vm858_vm3, 0.0, %v904_v18 }
 0x1b5   : > { %v1272_v23 = vsel %vm1244_vm4, %v3552_v3, %v1091_v32 }
 0x1b6   : > { %2893 = vmatmul.mubr.msk.f32.gmra.mxu1 %vm1312_vm6, %v1299_v45  ;;  %v906_v6 = vsel %vm858_vm3, %v904_v18, %v905_v16 }
 0x1b7   : > { %v1201_v58 = vpop.permute.xlu0 %1200  ;;  %2895 = vmatprep.mubr.msk.f32.mxu1 %vm1312_vm6, %v1300_v19 }
 0x1b8   : > { %v1203_v34 = vpop.permute.xlu1 %1202  ;;  %v1304_v51 = vsel %vm1277_vm5, %v1271_v36, %v1201_v58 }
 0x1b9   : > { %v1305_v20 = vsel %vm1277_vm5, %v1272_v23, %v1203_v34 }
 0x1ba   : > { %2896 = vmatmul.mubr.msk.f32.gmra.mxu1 %vm1312_vm6, %v1301_v9 }
 0x1bb   : > { %v1093_v52 = vpop.permute.xlu0 %1092  ;;  %2898 = vmatprep.mubr.msk.f32.mxu1 %vm1312_vm6, %v1302_v14  ;;  %v4013_v14 = vld [vmem:[%s4352_s5] ss:$0 sm:$0xff] }
 0x1bc   : > { %v1095_v63 = vpop.permute.xlu1 %1094  ;;  %v1273_v60 = vsel %vm1244_vm4, %v953_v5, %v1093_v52 }
 0x1bd   : > { %v1274_v3 = vsel %vm1244_vm4, %v903_v10, %v1095_v63 }
 0x1be   : > { %2899 = vmatmul.mubr.msk.f32.gmra.mxu1 %vm1312_vm6, %v1303_v56  ;;  %v4025_v56 = vld [vmem:[%s4353_s6] ss:$0 sm:$0xff] }
 0x1bf   : > { %v1205_v2 = vpop.permute.xlu0 %1204  ;;  %2901 = vmatprep.mubr.msk.f32.mxu1 %vm1312_vm6, %v1304_v51 }
 0x1c0   : > { %v1207_v40 = vpop.permute.xlu1 %1206  ;;  %v1306_v25 = vsel %vm1277_vm5, %v1273_v60, %v1205_v2 }
 0x1c1   : > { %v1307_v47 = vsel %vm1277_vm5, %v1274_v3, %v1207_v40 }
 0x1c2   : > { %2902 = vmatmul.mubr.msk.f32.gmra.mxu1 %vm1312_vm6, %v1305_v20 }
 0x1c3   : > { %v1097_v37 = vpop.permute.xlu0 %1096  ;;  %2904 = vmatprep.mubr.msk.f32.mxu1 %vm1312_vm6, %v1306_v25 }
 0x1c4   : > { %v1099_v17 = vpop.permute.xlu1 %1098  ;;  %v1275_v44 = vsel %vm1244_vm4, %v954_v62, %v1097_v37 }
 0x1c5   : > { %v1276_v13 = vsel %vm1244_vm4, %v906_v6, %v1099_v17 }
 0x1c6   : > { %2905 = vmatmul.mubr.msk.f32.gmra.mxu1 %vm1312_vm6, %v1307_v47 }
 0x1c7   : > { %v1209_v48 = vpop.permute.xlu0 %1208 }
 0x1c8   : > { %v1211_v29 = vpop.permute.xlu1 %1210  ;;  %v1308_v39 = vsel %vm1277_vm5, %v1275_v44, %v1209_v48 }
 0x1c9   : > { %v1309_v59 = vsel %vm1277_vm5, %v1276_v13, %v1211_v29  ;;  %2907 = vmatprep.mubr.msk.f32.mxu1 %vm1312_vm6, %v1308_v39 }
 0x1ca   : > { %2908 = vmatmul.mubr.msk.f32.gmra.mxu1 %vm1312_vm6, %v1309_v59  ;;  %v3021_v59 = vmov 0.0  }
 0x223   : > { %v3845_v33 = vpop.f32.mrf.mxu1 }
 0x224   : > { %1672 = vrot.lane.b32.xlu0 %v3845_v33, %s3019_s15 }
 0x225   : > { %v3849_v42 = vpop.f32.mrf.mxu1 }
 0x227   : > { %v3851_v57 = vpop.f32.mrf.mxu1 }
 0x228   : > { %1801 = vrot.lane.b32.xlu1 %v3851_v57, %s3020_s16  ;;  %1670 = vrot.lane.b32.xlu0 %v3849_v42, %s3019_s15 }
 0x229   : > { %v3861_v38 = vpop.f32.mrf.mxu1 }
 0x22c   : > { %1676 = vrot.lane.b32.xlu1 %v3851_v57, %s3019_s15  ;;  %1674 = vrot.lane.b32.xlu0 %v3861_v38, %s3019_s15 }
 0x230   : > { %1799 = vrot.lane.b32.xlu1 %v3861_v38, %s3020_s16 }
 0x236   : > { %v3870_v41 = vpop.f32.mrf.mxu1 }
 0x237   : > { %1805 = vrot.lane.b32.xlu1 %v3870_v41, %s3020_s16 }
 0x238   : > { %v3874_v46 = vpop.f32.mrf.mxu1 }
 0x239   : > { %1803 = vrot.lane.b32.xlu0 %v3874_v46, %s3020_s16 }
 0x23b   : > { %1680 = vrot.lane.b32.xlu1 %v3870_v41, %s3019_s15 }
 0x23d   : > { %1678 = vrot.lane.b32.xlu0 %v3874_v46, %s3019_s15 }
 0x246   : > { %v3882_v7 = vpop.f32.mrf.mxu1 }
 0x247   : > { %1809 = vrot.lane.b32.xlu1 %v3882_v7, %s3020_s16 }
 0x248   : > { %v3886_v8 = vpop.f32.mrf.mxu1 }
 0x249   : > { %1807 = vrot.lane.b32.xlu0 %v3886_v8, %s3020_s16 }
 0x24b   : > { %1684 = vrot.lane.b32.xlu1 %v3882_v7, %s3019_s15 }
 0x24d   : > { %1682 = vrot.lane.b32.xlu0 %v3886_v8, %s3019_s15 }
 0x252   : > { %v3894_v28 = vpop.f32.mrf.mxu1 }
 0x253   : > { %1813 = vrot.lane.b32.xlu1 %v3894_v28, %s3020_s16 }
 0x254   : > { %v3898_v15 = vpop.f32.mrf.mxu1 }
 0x255   : > { %1811 = vrot.lane.b32.xlu0 %v3898_v15, %s3020_s16 }
 0x257   : > { %1688 = vrot.lane.b32.xlu1 %v3894_v28, %s3019_s15 }
 0x259   : > { %1686 = vrot.lane.b32.xlu0 %v3898_v15, %s3019_s15 }
 0x25a   : > { %v3906_v24 = vpop.f32.mrf.mxu1 }
 0x25b   : > { %1817 = vrot.lane.b32.xlu1 %v3906_v24, %s3020_s16 }
 0x25c   : > { %v3910_v21 = vpop.f32.mrf.mxu1 }
 0x25d   : > { %1815 = vrot.lane.b32.xlu0 %v3910_v21, %s3020_s16 }
 0x25f   : > { %1692 = vrot.lane.b32.xlu1 %v3906_v24, %s3019_s15 }
 0x261   : > { %1690 = vrot.lane.b32.xlu0 %v3910_v21, %s3019_s15 }
 0x262   : > { %v3918_v27 = vpop.f32.mrf.mxu1 }
 0x263   : > { %1821 = vrot.lane.b32.xlu1 %v3918_v27, %s3020_s16 }
 0x264   : > { %v3922_v43 = vpop.f32.mrf.mxu1 }
 0x265   : > { %1819 = vrot.lane.b32.xlu0 %v3922_v43, %s3020_s16 }
 0x267   : > { %1696 = vrot.lane.b32.xlu1 %v3918_v27, %s3019_s15 }
 0x269   : > { %1694 = vrot.lane.b32.xlu0 %v3922_v43, %s3019_s15 }
 0x26a   : > { %v3930_v55 = vpop.f32.mrf.mxu1 }
 0x26b   : > { %1825 = vrot.lane.b32.xlu1 %v3930_v55, %s3020_s16 }
 0x26c   : > { %v3934_v53 = vpop.f32.mrf.mxu1 }
 0x26d   : > { %1823 = vrot.lane.b32.xlu0 %v3934_v53, %s3020_s16 }
 0x26e   : > { %v3940_v4 = vpop.f32.mrf.mxu1 }
 0x26f   : > { %1700 = vrot.lane.b32.xlu1 %v3930_v55, %s3019_s15 }
 0x270   : > { %v3946_v31 = vpop.f32.mrf.mxu1 }
 0x271   : > { %1698 = vrot.lane.b32.xlu0 %v3934_v53, %s3019_s15 }
 0x272   : > { %v3952_v49 = vpop.f32.mrf.mxu1 }
 0x273   : > { %1829 = vrot.lane.b32.xlu1 %v3940_v4, %s3020_s16 }
 0x274   : > { %v3958_v22 = vpop.f32.mrf.mxu1 }
 0x275   : > { %1827 = vrot.lane.b32.xlu0 %v3946_v31, %s3020_s16 }
 0x276   : > { %v3964_v32 = vpop.f32.mrf.mxu1 }
 0x277   : > { %1704 = vrot.lane.b32.xlu1 %v3940_v4, %s3019_s15 }
 0x278   : > { %v3970_v0 = vpop.f32.mrf.mxu1 }
 0x279   : > { %1702 = vrot.lane.b32.xlu0 %v3946_v31, %s3019_s15 }
 0x27a   : > { %v3976_v54 = vpop.f32.mrf.mxu1 }
 0x27b   : > { %1833 = vrot.lane.b32.xlu1 %v3952_v49, %s3020_s16 }
 0x27c   : > { %v3982_v61 = vpop.f32.mrf.mxu1 }
 0x27d   : > { %1831 = vrot.lane.b32.xlu0 %v3958_v22, %s3020_s16 }
 0x27e   : > { %v3988_v45 = vpop.f32.mrf.mxu1 }
 0x27f   : > { %1708 = vrot.lane.b32.xlu1 %v3952_v49, %s3019_s15 }
 0x280   : > { %v3994_v30 = vpop.f32.mrf.mxu1 }
 0x281   : > { %1706 = vrot.lane.b32.xlu0 %v3958_v22, %s3019_s15 }
 0x282   : > { %v4000_v19 = vpop.f32.mrf.mxu1 }
 0x283   : > { %1837 = vrot.lane.b32.xlu1 %v3964_v32, %s3020_s16 }
 0x284   : > { %v4006_v26 = vpop.f32.mrf.mxu1 }
 0x285   : > { %1835 = vrot.lane.b32.xlu0 %v3970_v0, %s3020_s16 }
 0x286   : > { %v4017_v63 = vpop.f32.mrf.mxu1 }
 0x287   : > { %1712 = vrot.lane.b32.xlu1 %v3964_v32, %s3019_s15 }
 0x288   : > { %v4029_v51 = vpop.f32.mrf.mxu1 }
 0x289   : > { %1710 = vrot.lane.b32.xlu0 %v3970_v0, %s3019_s15 }
 0x28a   : > { %v2909_v5 = vpop.f32.mrf.mxu1 }
 0x28b   : > { %1841 = vrot.lane.b32.xlu1 %v3976_v54, %s3020_s16 }
 0x28c   : > { %v1629_v37 = vpop.f32.mrf.mxu1 }
 0x28d   : > { %1839 = vrot.lane.b32.xlu0 %v3982_v61, %s3020_s16 }
 0x28f   : > { %1716 = vrot.lane.b32.xlu1 %v3976_v54, %s3019_s15 }
 0x291   : > { %1714 = vrot.lane.b32.xlu0 %v3982_v61, %s3019_s15 }
 0x293   : > { %1845 = vrot.lane.b32.xlu1 %v3988_v45, %s3020_s16 }
 0x295   : > { %1843 = vrot.lane.b32.xlu0 %v3994_v30, %s3020_s16 }
 0x296   : > { %v1673_v58 = vpop.permute.xlu0 %1672 }
 0x297   : > { %1720 = vrot.lane.b32.xlu1 %v3988_v45, %s3019_s15 }
 0x299   : > { %1718 = vrot.lane.b32.xlu0 %v3994_v30, %s3019_s15 }
 0x29a   : > { %v1802_v34 = vpop.permute.xlu1 %1801  ;;  %v1671_v11 = vpop.permute.xlu0 %1670 }
 0x29b   : > { %1849 = vrot.lane.b32.xlu1 %v4000_v19, %s3020_s16  ;;  %v1893_v9 = vadd.f32 %v1802_v34, %v1673_v58 }
 0x29d   : > { %1847 = vrot.lane.b32.xlu0 %v4006_v26, %s3020_s16  ;;  %v1932_v52 = vmul.f32 %v4013_v14, %v1893_v9 }
 0x29e   : > { %v1677_v1 = vpop.permute.xlu1 %1676  ;;  %v1675_v23 = vpop.permute.xlu0 %1674 }
 0x29f   : > { %1724 = vrot.lane.b32.xlu1 %v4000_v19, %s3019_s15  ;;  %v1971_v40 = vadd.f32 %v4025_v56, %v1932_v52  ;;  %v1769_v20 = vadd.f32 %v3845_v33, %v1677_v1  ;;  %v1768_v25 = vadd.f32 %v1675_v23, %v3849_v42 }
 0x2a1   : > { %1722 = vrot.lane.b32.xlu0 %v4006_v26, %s3019_s15  ;;  %v2003_v16 = vmax.f32 %v1971_v40, 0.0 }
 0x2a2   : > { %v1800_v12 = vpop.permute.xlu1 %1799 }
 0x2a3   : > { %v1892_v36 = vadd.f32 %v1800_v12, %v1671_v11  ;;  %1853 = vrot.lane.b32.xlu1 %v4017_v63, %s3020_s16 }
 0x2a5   : > { %v1931_v35 = vmul.f32 %v4013_v14, %v1892_v36  ;;  %1851 = vrot.lane.b32.xlu0 %v4029_v51, %s3020_s16 }
 0x2a7   : > { %v1970_v2 = vadd.f32 %v4025_v56, %v1931_v35  ;;  %1728 = vrot.lane.b32.xlu1 %v4017_v63, %s3019_s15 }
 0x2a9   : > { %v2002_v60 = vmax.f32 %v1970_v2, 0.0  ;;  %v1806_v18 = vpop.permute.xlu1 %1805  ;;  %1726 = vrot.lane.b32.xlu0 %v4029_v51, %s3019_s15 }
 0x2aa   : > { %v1895_v10 = vadd.f32 %v1806_v18, %v1769_v20 }
 0x2ab   : > { %2912 = vmatprep.mubr.msk.f32.mxu0 %vm1244_vm4, %v2002_v60  ;;  %v1804_v17 = vpop.permute.xlu0 %1803  ;;  %1857 = vrot.lane.b32.xlu1 %v2909_v5, %s3020_s16 }
 0x2ac   : > { %2913 = vmatmul.mubr.msk.f32.vlgmr.msra.gmra.mxu0 %vm1244_vm4, %v2003_v16  ;;  %v1934_v3 = vmul.f32 %v4013_v14, %v1895_v10  ;;  %v1894_v47 = vadd.f32 %v1804_v17, %v1768_v25 }
 0x2ad   : > { %1855 = vrot.lane.b32.xlu0 %v1629_v37, %s3020_s16  ;;  %v1681_v48 = vpop.permute.xlu1 %1680 }
 0x2ae   : > { %v1933_v6 = vmul.f32 %v4013_v14, %v1894_v47  ;;  %v1973_v62 = vadd.f32 %v4025_v56, %v1934_v3  ;;  %v1771_v33 = vadd.f32 %v3851_v57, %v1681_v48 }
 0x2af   : > { %1732 = vrot.lane.b32.xlu1 %v2909_v5, %s3019_s15  ;;  %v1679_v39 = vpop.permute.xlu0 %1678 }
 0x2b0   : > { %v1972_v13 = vadd.f32 %v4025_v56, %v1933_v6  ;;  %v2005_v29 = vmax.f32 %v1973_v62, 0.0  ;;  %v1770_v50 = vadd.f32 %v1679_v39, %v3861_v38 }
 0x2b1   : > { %1730 = vrot.lane.b32.xlu0 %v1629_v37, %s3019_s15 }
 0x2b2   : > { %v2004_v44 = vmax.f32 %v1972_v13, 0.0 }
 0x2b4   : > { %2915 = vmatprep.mubr.msk.f32.mxu0 %vm1244_vm4, %v2004_v44 }
 0x2b5   : > { %2916 = vmatmul.mubr.msk.f32.gmra.mxu0 %vm1244_vm4, %v2005_v29  ;;  %1859 = vrot.lane.b32.xlu0 %v3021_v59, %s3020_s16 }
 0x2b9   : > { %v1810_v42 = vpop.permute.xlu1 %1809 }
 0x2ba   : > { %v1897_v34 = vadd.f32 %v1810_v42, %v1771_v33 }
 0x2bb   : > { %v1808_v58 = vpop.permute.xlu0 %1807 }
 0x2bc   : > { %v1936_v9 = vmul.f32 %v4013_v14, %v1897_v34  ;;  %v1896_v1 = vadd.f32 %v1808_v58, %v1770_v50 }
 0x2bd   : > { %v1685_v36 = vpop.permute.xlu1 %1684 }
 0x2be   : > { %v1935_v52 = vmul.f32 %v4013_v14, %v1896_v1  ;;  %v1975_v11 = vadd.f32 %v4025_v56, %v1936_v9  ;;  %v1773_v57 = vadd.f32 %v3870_v41, %v1685_v36 }
 0x2bf   : > { %v1683_v2 = vpop.permute.xlu0 %1682 }
 0x2c0   : > { %v1974_v12 = vadd.f32 %v4025_v56, %v1935_v52  ;;  %v2007_v40 = vmax.f32 %v1975_v11, 0.0  ;;  %v1772_v23 = vadd.f32 %v1683_v2, %v3874_v46 }
 0x2c2   : > { %v2006_v35 = vmax.f32 %v1974_v12, 0.0 }
 0x2c4   : > { %2918 = vmatprep.mubr.msk.f32.mxu0 %vm1244_vm4, %v2006_v35 }
 0x2c5   : > { %v1814_v38 = vpop.permute.xlu1 %1813  ;;  %2919 = vmatmul.mubr.msk.f32.gmra.mxu0 %vm1244_vm4, %v2007_v40 }
 0x2c6   : > { %v1899_v5 = vadd.f32 %v1814_v38, %v1773_v57 }
 0x2c7   : > { %v1812_v20 = vpop.permute.xlu0 %1811 }
 0x2c8   : > { %v1938_v60 = vmul.f32 %v4013_v14, %v1899_v5  ;;  %v1898_v16 = vadd.f32 %v1812_v20, %v1772_v23 }
 0x2c9   : > { %v1689_v18 = vpop.permute.xlu1 %1688 }
 0x2ca   : > { %v1937_v25 = vmul.f32 %v4013_v14, %v1898_v16  ;;  %v1977_v10 = vadd.f32 %v4025_v56, %v1938_v60  ;;  %v1775_v37 = vadd.f32 %v3882_v7, %v1689_v18 }
 0x2cb   : > { %v1687_v17 = vpop.permute.xlu0 %1686 }
 0x2cc   : > { %v1976_v41 = vadd.f32 %v4025_v56, %v1937_v25  ;;  %v1774_v6 = vadd.f32 %v1687_v17, %v3886_v8  ;;  %v2009_v62 = vmax.f32 %v1977_v10, 0.0 }
 0x2cd   : > { %v1818_v3 = vpop.permute.xlu1 %1817 }
 0x2ce   : > { %v2008_v47 = vmax.f32 %v1976_v41, 0.0  ;;  %v1901_v46 = vadd.f32 %v1818_v3, %v1775_v37 }
 0x2cf   : > { %v1816_v13 = vpop.permute.xlu0 %1815 }
 0x2d0   : > { %v1940_v44 = vmul.f32 %v4013_v14, %v1901_v46  ;;  %v1900_v29 = vadd.f32 %v1816_v13, %v1774_v6  ;;  %2921 = vmatprep.mubr.msk.f32.mxu0 %vm1244_vm4, %v2008_v47 }
 0x2d1   : > { %v1693_v48 = vpop.permute.xlu1 %1692  ;;  %2922 = vmatmul.mubr.msk.f32.gmra.mxu0 %vm1244_vm4, %v2009_v62 }
 0x2d2   : > { %v1939_v59 = vmul.f32 %v4013_v14, %v1900_v29  ;;  %v1979_v39 = vadd.f32 %v4025_v56, %v1940_v44  ;;  %v1777_v8 = vadd.f32 %v3894_v28, %v1693_v48 }
 0x2d3   : > { %v1691_v7 = vpop.permute.xlu0 %1690 }
 0x2d4   : > { %v1978_v33 = vadd.f32 %v4025_v56, %v1939_v59  ;;  %v1776_v34 = vadd.f32 %v1691_v7, %v3898_v15  ;;  %v2011_v9 = vmax.f32 %v1979_v39, 0.0 }
 0x2d5   : > { %v1822_v42 = vpop.permute.xlu1 %1821 }
 0x2d6   : > { %v2010_v50 = vmax.f32 %v1978_v33, 0.0  ;;  %v1903_v58 = vadd.f32 %v1822_v42, %v1777_v8 }
 0x2d7   : > { %v1820_v1 = vpop.permute.xlu0 %1819 }
 0x2d8   : > { %v1942_v52 = vmul.f32 %v4013_v14, %v1903_v58  ;;  %v1902_v11 = vadd.f32 %v1820_v1, %v1776_v34  ;;  %2924 = vmatprep.mubr.msk.f32.mxu0 %vm1244_vm4, %v2010_v50 }
 0x2d9   : > { %v1697_v12 = vpop.permute.xlu1 %1696  ;;  %2925 = vmatmul.mubr.msk.f32.gmra.mxu0 %vm1244_vm4, %v2011_v9 }
 0x2da   : > { %v1941_v36 = vmul.f32 %v4013_v14, %v1902_v11  ;;  %v1981_v35 = vadd.f32 %v4025_v56, %v1942_v52  ;;  %v1779_v15 = vadd.f32 %v3906_v24, %v1697_v12 }
 0x2db   : > { %v1695_v28 = vpop.permute.xlu0 %1694 }
 0x2dc   : > { %v1980_v40 = vadd.f32 %v4025_v56, %v1941_v36  ;;  %v1778_v38 = vadd.f32 %v1695_v28, %v3910_v21  ;;  %v2013_v5 = vmax.f32 %v1981_v35, 0.0 }
 0x2dd   : > { %v1826_v2 = vpop.permute.xlu1 %1825 }
 0x2de   : > { %v2012_v57 = vmax.f32 %v1980_v40, 0.0  ;;  %v1905_v23 = vadd.f32 %v1826_v2, %v1779_v15 }
 0x2df   : > { %v1824_v20 = vpop.permute.xlu0 %1823 }
 0x2e0   : > { %v1944_v60 = vmul.f32 %v4013_v14, %v1905_v23  ;;  %v1904_v16 = vadd.f32 %v1824_v20, %v1778_v38  ;;  %2927 = vmatprep.mubr.msk.f32.mxu0 %vm1244_vm4, %v2012_v57 }
 0x2e1   : > { %2928 = vmatmul.mubr.msk.f32.gmra.mxu0 %vm1244_vm4, %v2013_v5  ;;  %v1701_v18 = vpop.permute.xlu1 %1700 }
 0x2e2   : > { %v1943_v25 = vmul.f32 %v4013_v14, %v1904_v16  ;;  %v1983_v10 = vadd.f32 %v4025_v56, %v1944_v60  ;;  %v1781_v21 = vadd.f32 %v3918_v27, %v1701_v18 }
 0x2e3   : > { %v1699_v24 = vpop.permute.xlu0 %1698 }
 0x2e4   : > { %v1982_v17 = vadd.f32 %v4025_v56, %v1943_v25  ;;  %v1780_v3 = vadd.f32 %v1699_v24, %v3922_v43  ;;  %v2015_v6 = vmax.f32 %v1983_v10, 0.0 }
 0x2e5   : > { %v1830_v41 = vpop.permute.xlu1 %1829 }
 0x2e6   : > { %v2014_v37 = vmax.f32 %v1982_v17, 0.0  ;;  %v1907_v47 = vadd.f32 %v1830_v41, %v1781_v21 }
 0x2e7   : > { %v1828_v46 = vpop.permute.xlu0 %1827 }
 0x2e8   : > { %v1946_v62 = vmul.f32 %v4013_v14, %v1907_v47  ;;  %v1906_v13 = vadd.f32 %v1828_v46, %v1780_v3  ;;  %2930 = vmatprep.mubr.msk.f32.mxu0 %vm1244_vm4, %v2014_v37 }
 0x2e9   : > { %2931 = vmatmul.mubr.msk.f32.gmra.mxu0 %vm1244_vm4, %v2015_v6  ;;  %v1705_v44 = vpop.permute.xlu1 %1704 }
 0x2ea   : > { %v1945_v29 = vmul.f32 %v4013_v14, %v1906_v13  ;;  %v1985_v48 = vadd.f32 %v4025_v56, %v1946_v62  ;;  %v1783_v43 = vadd.f32 %v3930_v55, %v1705_v44 }
 0x2eb   : > { %v1703_v27 = vpop.permute.xlu0 %1702 }
 0x2ec   : > { %v1984_v59 = vadd.f32 %v4025_v56, %v1945_v29  ;;  %v1782_v33 = vadd.f32 %v1703_v27, %v3934_v53  ;;  %v2017_v42 = vmax.f32 %v1985_v48, 0.0 }
 0x2ed   : > { %v1834_v39 = vpop.permute.xlu1 %1833 }
 0x2ee   : > { %v2016_v7 = vmax.f32 %v1984_v59, 0.0  ;;  %v1909_v8 = vadd.f32 %v1834_v39, %v1783_v43 }
 0x2ef   : > { %v1832_v50 = vpop.permute.xlu0 %1831 }
 0x2f0   : > { %v1948_v34 = vmul.f32 %v4013_v14, %v1909_v8  ;;  %v1908_v58 = vadd.f32 %v1832_v50, %v1782_v33  ;;  %2933 = vmatprep.mubr.msk.f32.mxu0 %vm1244_vm4, %v2016_v7 }
 0x2f1   : > { %2934 = vmatmul.mubr.msk.f32.gmra.mxu0 %vm1244_vm4, %v2017_v42  ;;  %v1709_v9 = vpop.permute.xlu1 %1708 }
 0x2f2   : > { %v1947_v1 = vmul.f32 %v4013_v14, %v1908_v58  ;;  %v1987_v52 = vadd.f32 %v4025_v56, %v1948_v34  ;;  %v1785_v53 = vadd.f32 %v3940_v4, %v1709_v9 }
 0x2f3   : > { %v1707_v55 = vpop.permute.xlu0 %1706 }
 0x2f4   : > { %v1986_v11 = vadd.f32 %v4025_v56, %v1947_v1  ;;  %v1784_v35 = vadd.f32 %v1707_v55, %v3946_v31  ;;  %v2019_v40 = vmax.f32 %v1987_v52, 0.0 }
 0x2f5   : > { %v1838_v12 = vpop.permute.xlu1 %1837 }
 0x2f6   : > { %v2018_v36 = vmax.f32 %v1986_v11, 0.0  ;;  %v1911_v28 = vadd.f32 %v1838_v12, %v1785_v53 }
 0x2f7   : > { %v1836_v15 = vpop.permute.xlu0 %1835 }
 0x2f8   : > { %v1950_v2 = vmul.f32 %v4013_v14, %v1911_v28  ;;  %v1910_v57 = vadd.f32 %v1836_v15, %v1784_v35  ;;  %2936 = vmatprep.mubr.msk.f32.mxu0 %vm1244_vm4, %v2018_v36 }
 0x2f9   : > { %2937 = vmatmul.mubr.msk.f32.gmra.mxu0 %vm1244_vm4, %v2019_v40  ;;  %v1713_v38 = vpop.permute.xlu1 %1712 }
 0x2fa   : > { %v1949_v23 = vmul.f32 %v4013_v14, %v1910_v57  ;;  %v1989_v5 = vadd.f32 %v4025_v56, %v1950_v2  ;;  %v1787_v31 = vadd.f32 %v3952_v49, %v1713_v38 }
 0x2fb   : > { %v1711_v4 = vpop.permute.xlu0 %1710 }
 0x2fc   : > { %v1988_v20 = vadd.f32 %v4025_v56, %v1949_v23  ;;  %v1786_v18 = vadd.f32 %v1711_v4, %v3958_v22  ;;  %v2021_v10 = vmax.f32 %v1989_v5, 0.0 }
 0x2fd   : > { %v1842_v60 = vpop.permute.xlu1 %1841 }
 0x2fe   : > { %v2020_v16 = vmax.f32 %v1988_v20, 0.0  ;;  %v1913_v25 = vadd.f32 %v1842_v60, %v1787_v31 }
 0x2ff   : > { %v1840_v24 = vpop.permute.xlu0 %1839 }
 0x300   : > { %v1952_v17 = vmul.f32 %v4013_v14, %v1913_v25  ;;  %v1912_v21 = vadd.f32 %v1840_v24, %v1786_v18  ;;  %2939 = vmatprep.mubr.msk.f32.mxu0 %vm1244_vm4, %v2020_v16 }
 0x301   : > { %2940 = vmatmul.mubr.msk.f32.gmra.mxu0 %vm1244_vm4, %v2021_v10  ;;  %v1717_v41 = vpop.permute.xlu1 %1716 }
 0x302   : > { %v1951_v37 = vmul.f32 %v4013_v14, %v1912_v21  ;;  %v1991_v3 = vadd.f32 %v4025_v56, %v1952_v17  ;;  %v1789_v22 = vadd.f32 %v3964_v32, %v1717_v41 }
 0x303   : > { %v1715_v49 = vpop.permute.xlu0 %1714 }
 0x304   : > { %v1990_v47 = vadd.f32 %v4025_v56, %v1951_v37  ;;  %v1788_v62 = vadd.f32 %v1715_v49, %v3970_v0  ;;  %v2023_v44 = vmax.f32 %v1991_v3, 0.0 }
 0x305   : > { %v1846_v6 = vpop.permute.xlu1 %1845 }
 0x306   : > { %v2022_v46 = vmax.f32 %v1990_v47, 0.0  ;;  %v1915_v13 = vadd.f32 %v1846_v6, %v1789_v22 }
 0x307   : > { %v1844_v29 = vpop.permute.xlu0 %1843 }
 0x308   : > { %v1954_v48 = vmul.f32 %v4013_v14, %v1915_v13  ;;  %v1914_v27 = vadd.f32 %v1844_v29, %v1788_v62  ;;  %2942 = vmatprep.mubr.msk.f32.mxu0 %vm1244_vm4, %v2022_v46 }
 0x309   : > { %2943 = vmatmul.mubr.msk.f32.gmra.mxu0 %vm1244_vm4, %v2023_v44  ;;  %v1721_v59 = vpop.permute.xlu1 %1720 }
 0x30a   : > { %v1953_v43 = vmul.f32 %v4013_v14, %v1914_v27  ;;  %v1993_v39 = vadd.f32 %v4025_v56, %v1954_v48  ;;  %v1791_v0 = vadd.f32 %v3976_v54, %v1721_v59  ;;  %v4170_v48 = vld [vmem:[%s4355_s8] ss:$0 sm:$0xff] }
 0x30b   : > { %v1719_v32 = vpop.permute.xlu0 %1718 }
 0x30c   : > { %v1992_v7 = vadd.f32 %v4025_v56, %v1953_v43  ;;  %v1790_v42 = vadd.f32 %v1719_v32, %v3982_v61  ;;  %v2025_v34 = vmax.f32 %v1993_v39, 0.0  ;;  %v2977_v32 = vld [vmem:[%s3099_s22 + $0x8] sm:$0xff] }
 0x30d   : > { %v1850_v33 = vpop.permute.xlu1 %1849 }
 0x30e   : > { %v2024_v8 = vmax.f32 %v1992_v7, 0.0  ;;  %v1917_v50 = vadd.f32 %v1850_v33, %v1791_v0 }
 0x30f   : > { %v1848_v58 = vpop.permute.xlu0 %1847 }
 0x310   : > { %v1956_v9 = vmul.f32 %v4013_v14, %v1917_v50  ;;  %v1916_v1 = vadd.f32 %v1848_v58, %v1790_v42  ;;  %2945 = vmatprep.mubr.msk.f32.mxu0 %vm1244_vm4, %v2024_v8  ;;  %v2978_v8 = vld [vmem:[%s3099_s22] sm:$0xff] }
 0x311   : > { %2946 = vmatmul.mubr.msk.f32.gmra.mxu0 %vm1244_vm4, %v2025_v34  ;;  %v1725_v52 = vpop.permute.xlu1 %1724 }
 0x312   : > { %v1955_v55 = vmul.f32 %v4013_v14, %v1916_v1  ;;  %v1995_v11 = vadd.f32 %v4025_v56, %v1956_v9  ;;  %v1793_v61 = vadd.f32 %v3988_v45, %v1725_v52 }
 0x313   : > { %v1723_v54 = vpop.permute.xlu0 %1722 }
 0x314   : > { %v1994_v53 = vadd.f32 %v4025_v56, %v1955_v55  ;;  %v1792_v35 = vadd.f32 %v1723_v54, %v3994_v30  ;;  %v2027_v40 = vmax.f32 %v1995_v11, 0.0  ;;  %v2979_v55 = vld [vmem:[%s3099_s22 + $0x18] sm:$0xff] }
 0x315   : > { %v1854_v12 = vpop.permute.xlu1 %1853 }
 0x316   : > { %v2026_v36 = vmax.f32 %v1994_v53, 0.0  ;;  %v1919_v28 = vadd.f32 %v1854_v12, %v1793_v61  ;;  %v2980_v61 = vld [vmem:[%s3099_s22 + $0x10] sm:$0xff] }
 0x317   : > { %v1852_v15 = vpop.permute.xlu0 %1851 }
 0x318   : > { %v1958_v2 = vmul.f32 %v4013_v14, %v1919_v28  ;;  %v1918_v57 = vadd.f32 %v1852_v15, %v1792_v35  ;;  %2948 = vmatprep.mubr.msk.f32.mxu0 %vm1244_vm4, %v2026_v36 }
 0x319   : > { %2949 = vmatmul.mubr.msk.f32.gmra.mxu0 %vm1244_vm4, %v2027_v40  ;;  %v1729_v38 = vpop.permute.xlu1 %1728 }
 0x31a   : > { %v1957_v23 = vmul.f32 %v4013_v14, %v1918_v57  ;;  %v1997_v5 = vadd.f32 %v4025_v56, %v1958_v2  ;;  %v1795_v30 = vadd.f32 %v4000_v19, %v1729_v38  ;;  %v2981_v57 = vld [vmem:[%s3099_s22 + $0x28] sm:$0xff] }
 0x31b   : > { %v1727_v45 = vpop.permute.xlu0 %1726 }
 0x31c   : > { %v1996_v4 = vadd.f32 %v4025_v56, %v1957_v23  ;;  %v1794_v60 = vadd.f32 %v1727_v45, %v4006_v26  ;;  %v2029_v18 = vmax.f32 %v1997_v5, 0.0  ;;  %v2982_v45 = vld [vmem:[%s3099_s22 + $0x20] sm:$0xff] }
 0x31d   : > { %v1858_v20 = vpop.permute.xlu1 %1857 }
 0x31e   : > { %v2028_v31 = vmax.f32 %v1996_v4, 0.0  ;;  %v1921_v16 = vadd.f32 %v1858_v20, %v1795_v30 }
 0x31f   : > { %v1856_v25 = vpop.permute.xlu0 %1855 }
 0x320   : > { %v1960_v10 = vmul.f32 %v4013_v14, %v1921_v16  ;;  %v1920_v24 = vadd.f32 %v1856_v25, %v1794_v60  ;;  %2951 = vmatprep.mubr.msk.f32.mxu0 %vm1244_vm4, %v2028_v31  ;;  %v2983_v25 = vld [vmem:[%s3099_s22 + $0x38] sm:$0xff] }
 0x321   : > { %2952 = vmatmul.mubr.msk.f32.gmra.mxu0 %vm1244_vm4, %v2029_v18  ;;  %v1733_v41 = vpop.permute.xlu1 %1732 }
 0x322   : > { %v1959_v17 = vmul.f32 %v4013_v14, %v1920_v24  ;;  %v1999_v21 = vadd.f32 %v4025_v56, %v1960_v10  ;;  %v1797_v26 = vadd.f32 %v4017_v63, %v1733_v41 }
 0x323   : > { %v1731_v19 = vpop.permute.xlu0 %1730 }
 0x324   : > { %v1998_v37 = vadd.f32 %v4025_v56, %v1959_v17  ;;  %v1796_v49 = vadd.f32 %v1731_v19, %v4029_v51  ;;  %v2031_v47 = vmax.f32 %v1999_v21, 0.0  ;;  %v2984_v21 = vld [vmem:[%s3099_s22 + $0x30] sm:$0xff] }
 0x326   : > { %v2030_v3 = vmax.f32 %v1998_v37, 0.0 }
 0x327   : > { %v1860_v22 = vpop.permute.xlu0 %1859 }
 0x328   : > { %v1922_v6 = vadd.f32 %v1860_v22, %v1796_v49  ;;  %v1923_v46 = vadd.f32 %v1860_v22, %v1797_v26  ;;  %2954 = vmatprep.mubr.msk.f32.mxu0 %vm1244_vm4, %v2030_v3  ;;  %v2985_v22 = vld [vmem:[%s3099_s22 + $0x48] sm:$0xff] }
 0x329   : > { %2955 = vmatmul.mubr.msk.f32.gmra.mxu0 %vm1244_vm4, %v2031_v47 }
 0x32a   : > { %v1961_v62 = vmul.f32 %v4013_v14, %v1922_v6  ;;  %v1962_v13 = vmul.f32 %v4013_v14, %v1923_v46  ;;  %v4175_v14 = vld [vmem:[%s4356_s9] ss:$0 sm:$0xff] }
 0x32c   : > { %v2000_v44 = vadd.f32 %v4025_v56, %v1961_v62  ;;  %v2001_v63 = vadd.f32 %v4025_v56, %v1962_v13  ;;  %v2986_v13 = vld [vmem:[%s3099_s22 + $0x40] sm:$0xff] }
 0x32e   : > { %v2032_v29 = vmax.f32 %v2000_v44, 0.0  ;;  %v2033_v51 = vmax.f32 %v2001_v63, 0.0 }
 0x330   : > { %2957 = vmatprep.mubr.msk.f32.mxu0 %vm1244_vm4, %v2032_v29 }
 0x331   : > { %2958 = vmatmul.mubr.msk.f32.gmra.mxu0 %vm1244_vm4, %v2033_v51 }
 0x36c   : > { %v2914_v27 = vpop.f32.mrf.mxu0 }
 0x36d   : > { %v2367_v56 = vmul.f32 %v2914_v27, %v4170_v48 }
 0x36e   : > { %v2200_v59 = vpop.f32.mrf.mxu0 }
 0x36f   : > { %v2406_v43 = vadd.f32 %v4175_v14, %v2367_v56  ;;  %v2366_v39 = vmul.f32 %v4170_v48, %v2200_v59 }
 0x371   : > { %v2438_v7 = vadd.f32 %v2977_v32, %v2406_v43  ;;  %v2405_v0 = vadd.f32 %v4175_v14, %v2366_v39  ;;  %v2987_v43 = vld [vmem:[%s3099_s22 + $0x58] sm:$0xff] }
 0x373   : > { %v2470_v33 = vmax.f32 %v2438_v7, 0.0  ;;  %v2437_v42 = vadd.f32 %v2978_v8, %v2405_v0  ;;  %v2988_v0 = vld [vmem:[%s3099_s22 + $0x50] sm:$0xff] }
 0x375   : > { %2502 = vst.msk [vmem:[%s4187_s11 + $0x8] sm:$0xff] %vm394_vm0, %v2470_v33  ;;  %v2469_v50 = vmax.f32 %v2437_v42, 0.0  ;;  %v2917_v34 = vpop.f32.mrf.mxu0 }
 0x376   : > { %v2369_v58 = vmul.f32 %v2917_v34, %v4170_v48 }
 0x377   : > { %2501 = vst.msk [vmem:[%s4187_s11] sm:$0xff] %vm394_vm0, %v2469_v50  ;;  %v2210_v9 = vpop.f32.mrf.mxu0 }
 0x378   : > { %v2408_v1 = vadd.f32 %v4175_v14, %v2369_v58  ;;  %v2368_v52 = vmul.f32 %v4170_v48, %v2210_v9 }
 0x37a   : > { %v2440_v11 = vadd.f32 %v2979_v55, %v2408_v1  ;;  %v2407_v54 = vadd.f32 %v4175_v14, %v2368_v52  ;;  %v2989_v1 = vld [vmem:[%s3099_s22 + $0x68] sm:$0xff] }
 0x37c   : > { %v2472_v53 = vmax.f32 %v2440_v11, 0.0  ;;  %v2439_v12 = vadd.f32 %v2980_v61, %v2407_v54  ;;  %v2990_v54 = vld [vmem:[%s3099_s22 + $0x60] sm:$0xff] }
 0x37e   : > { %2504 = vst.msk [vmem:[%s4187_s11 + $0x18] sm:$0xff] %vm394_vm0, %v2472_v53  ;;  %v2471_v36 = vmax.f32 %v2439_v12, 0.0 }
 0x380   : > { %2503 = vst.msk [vmem:[%s4187_s11 + $0x10] sm:$0xff] %vm394_vm0, %v2471_v36 }
 0x385   : > { %v2920_v35 = vpop.f32.mrf.mxu0 }
 0x386   : > { %v2371_v28 = vmul.f32 %v2920_v35, %v4170_v48 }
 0x387   : > { %v2220_v40 = vpop.f32.mrf.mxu0 }
 0x388   : > { %v2410_v15 = vadd.f32 %v4175_v14, %v2371_v28  ;;  %v2370_v2 = vmul.f32 %v4170_v48, %v2220_v40 }
 0x38a   : > { %v2442_v38 = vadd.f32 %v2981_v57, %v2410_v15  ;;  %v2409_v23 = vadd.f32 %v4175_v14, %v2370_v2  ;;  %v2991_v15 = vld [vmem:[%s3099_s22 + $0x78] sm:$0xff] }
 0x38c   : > { %v2474_v5 = vmax.f32 %v2442_v38, 0.0  ;;  %v2441_v4 = vadd.f32 %v2982_v45, %v2409_v23  ;;  %v2992_v23 = vld [vmem:[%s3099_s22 + $0x70] sm:$0xff] }
 0x38e   : > { %2506 = vst.msk [vmem:[%s4187_s11 + $0x28] sm:$0xff] %vm394_vm0, %v2474_v5  ;;  %v2473_v30 = vmax.f32 %v2441_v4, 0.0 }
 0x390   : > { %2505 = vst.msk [vmem:[%s4187_s11 + $0x20] sm:$0xff] %vm394_vm0, %v2473_v30 }
 0x391   : > { %v2923_v20 = vpop.f32.mrf.mxu0 }
 0x392   : > { %v2373_v31 = vmul.f32 %v2923_v20, %v4170_v48 }
 0x393   : > { %v2230_v60 = vpop.f32.mrf.mxu0 }
 0x394   : > { %v2412_v16 = vadd.f32 %v4175_v14, %v2373_v31  ;;  %v2372_v18 = vmul.f32 %v4170_v48, %v2230_v60 }
 0x396   : > { %v2444_v10 = vadd.f32 %v2983_v25, %v2412_v16  ;;  %v2411_v24 = vadd.f32 %v4175_v14, %v2372_v18  ;;  %v2993_v16 = vld [vmem:[%s3099_s22 + $0x88] sm:$0xff] }
 0x398   : > { %v2476_v17 = vmax.f32 %v2444_v10, 0.0  ;;  %v2443_v41 = vadd.f32 %v2984_v21, %v2411_v24  ;;  %v2994_v24 = vld [vmem:[%s3099_s22 + $0x80] sm:$0xff] }
 0x399   : > { %v2926_v19 = vpop.f32.mrf.mxu0 }
 0x39a   : > { %2508 = vst.msk [vmem:[%s4187_s11 + $0x38] sm:$0xff] %vm394_vm0, %v2476_v17  ;;  %v2475_v37 = vmax.f32 %v2443_v41, 0.0  ;;  %v2375_v3 = vmul.f32 %v2926_v19, %v4170_v48 }
 0x39b   : > { %v2240_v26 = vpop.f32.mrf.mxu0 }
 0x39c   : > { %2507 = vst.msk [vmem:[%s4187_s11 + $0x30] sm:$0xff] %vm394_vm0, %v2475_v37  ;;  %v2414_v49 = vadd.f32 %v4175_v14, %v2375_v3  ;;  %v2374_v47 = vmul.f32 %v4170_v48, %v2240_v26 }
 0x39e   : > { %v2446_v6 = vadd.f32 %v2985_v22, %v2414_v49  ;;  %v2413_v46 = vadd.f32 %v4175_v14, %v2374_v47  ;;  %v2995_v49 = vld [vmem:[%s3099_s22 + $0x98] sm:$0xff] }
 0x3a0   : > { %v2478_v62 = vmax.f32 %v2446_v6, 0.0  ;;  %v2445_v44 = vadd.f32 %v2986_v13, %v2413_v46  ;;  %v2996_v46 = vld [vmem:[%s3099_s22 + $0x90] sm:$0xff] }
 0x3a1   : > { %v2929_v63 = vpop.f32.mrf.mxu0 }
 0x3a2   : > { %2510 = vst.msk [vmem:[%s4187_s11 + $0x48] sm:$0xff] %vm394_vm0, %v2478_v62  ;;  %v2477_v29 = vmax.f32 %v2445_v44, 0.0  ;;  %v2377_v51 = vmul.f32 %v2929_v63, %v4170_v48 }
 0x3a3   : > { %v2250_v27 = vpop.f32.mrf.mxu0 }
 0x3a4   : > { %2509 = vst.msk [vmem:[%s4187_s11 + $0x40] sm:$0xff] %vm394_vm0, %v2477_v29  ;;  %v2416_v56 = vadd.f32 %v4175_v14, %v2377_v51  ;;  %v2376_v59 = vmul.f32 %v4170_v48, %v2250_v27 }
 0x3a6   : > { %v2448_v39 = vadd.f32 %v2987_v43, %v2416_v56  ;;  %v2415_v32 = vadd.f32 %v4175_v14, %v2376_v59  ;;  %v2997_v56 = vld [vmem:[%s3099_s22 + $0xa8] sm:$0xff] }
 0x3a8   : > { %v2480_v7 = vmax.f32 %v2448_v39, 0.0  ;;  %v2447_v33 = vadd.f32 %v2988_v0, %v2415_v32  ;;  %v2998_v32 = vld [vmem:[%s3099_s22 + $0xa0] sm:$0xff] }
 0x3a9   : > { %v2932_v8 = vpop.f32.mrf.mxu0 }
 0x3aa   : > { %2512 = vst.msk [vmem:[%s4187_s11 + $0x58] sm:$0xff] %vm394_vm0, %v2480_v7  ;;  %v2479_v42 = vmax.f32 %v2447_v33, 0.0  ;;  %v2379_v50 = vmul.f32 %v2932_v8, %v4170_v48 }
 0x3ab   : > { %v2260_v34 = vpop.f32.mrf.mxu0 }
 0x3ac   : > { %2511 = vst.msk [vmem:[%s4187_s11 + $0x50] sm:$0xff] %vm394_vm0, %v2479_v42  ;;  %v2418_v58 = vadd.f32 %v4175_v14, %v2379_v50  ;;  %v2378_v9 = vmul.f32 %v4170_v48, %v2260_v34 }
 0x3ae   : > { %v2450_v52 = vadd.f32 %v2989_v1, %v2418_v58  ;;  %v2417_v55 = vadd.f32 %v4175_v14, %v2378_v9  ;;  %v2999_v58 = vld [vmem:[%s3099_s22 + $0xb8] sm:$0xff] }
 0x3b0   : > { %v2482_v11 = vmax.f32 %v2450_v52, 0.0  ;;  %v2449_v53 = vadd.f32 %v2990_v54, %v2417_v55  ;;  %v3000_v55 = vld [vmem:[%s3099_s22 + $0xb0] sm:$0xff] }
 0x3b1   : > { %v2935_v61 = vpop.f32.mrf.mxu0 }
 0x3b2   : > { %2514 = vst.msk [vmem:[%s4187_s11 + $0x68] sm:$0xff] %vm394_vm0, %v2482_v11  ;;  %v2481_v12 = vmax.f32 %v2449_v53, 0.0  ;;  %v2381_v36 = vmul.f32 %v2935_v61, %v4170_v48 }
 0x3b3   : > { %v2270_v35 = vpop.f32.mrf.mxu0 }
 0x3b4   : > { %2513 = vst.msk [vmem:[%s4187_s11 + $0x60] sm:$0xff] %vm394_vm0, %v2481_v12  ;;  %v2420_v28 = vadd.f32 %v4175_v14, %v2381_v36  ;;  %v2380_v40 = vmul.f32 %v4170_v48, %v2270_v35 }
 0x3b6   : > { %v2452_v2 = vadd.f32 %v2991_v15, %v2420_v28  ;;  %v2419_v57 = vadd.f32 %v4175_v14, %v2380_v40  ;;  %v3001_v28 = vld [vmem:[%s3099_s22 + $0xc8] sm:$0xff] }
 0x3b8   : > { %v2484_v38 = vmax.f32 %v2452_v2, 0.0  ;;  %v2451_v5 = vadd.f32 %v2992_v23, %v2419_v57  ;;  %v3002_v57 = vld [vmem:[%s3099_s22 + $0xc0] sm:$0xff] }
 0x3b9   : > { %v2938_v45 = vpop.f32.mrf.mxu0 }
 0x3ba   : > { %2516 = vst.msk [vmem:[%s4187_s11 + $0x78] sm:$0xff] %vm394_vm0, %v2484_v38  ;;  %v2483_v4 = vmax.f32 %v2451_v5, 0.0  ;;  %v2383_v30 = vmul.f32 %v2938_v45, %v4170_v48 }
 0x3bb   : > { %v2280_v20 = vpop.f32.mrf.mxu0 }
 0x3bc   : > { %2515 = vst.msk [vmem:[%s4187_s11 + $0x70] sm:$0xff] %vm394_vm0, %v2483_v4  ;;  %v2422_v31 = vadd.f32 %v4175_v14, %v2383_v30  ;;  %v2382_v60 = vmul.f32 %v4170_v48, %v2280_v20 }
 0x3be   : > { %v2454_v18 = vadd.f32 %v2993_v16, %v2422_v31  ;;  %v2421_v25 = vadd.f32 %v4175_v14, %v2382_v60  ;;  %v3003_v31 = vld [vmem:[%s3099_s22 + $0xd8] sm:$0xff] }
 0x3c0   : > { %v2486_v10 = vmax.f32 %v2454_v18, 0.0  ;;  %v2453_v17 = vadd.f32 %v2994_v24, %v2421_v25  ;;  %v3004_v25 = vld [vmem:[%s3099_s22 + $0xd0] sm:$0xff] }
 0x3c1   : > { %v2941_v21 = vpop.f32.mrf.mxu0 }
 0x3c2   : > { %2518 = vst.msk [vmem:[%s4187_s11 + $0x88] sm:$0xff] %vm394_vm0, %v2486_v10  ;;  %v2485_v41 = vmax.f32 %v2453_v17, 0.0  ;;  %v2385_v19 = vmul.f32 %v2941_v21, %v4170_v48 }
 0x3c3   : > { %v2290_v37 = vpop.f32.mrf.mxu0 }
 0x3c4   : > { %2517 = vst.msk [vmem:[%s4187_s11 + $0x80] sm:$0xff] %vm394_vm0, %v2485_v41  ;;  %v2424_v3 = vadd.f32 %v4175_v14, %v2385_v19  ;;  %v2384_v26 = vmul.f32 %v4170_v48, %v2290_v37 }
 0x3c6   : > { %v2456_v47 = vadd.f32 %v2995_v49, %v2424_v3  ;;  %v2423_v22 = vadd.f32 %v4175_v14, %v2384_v26  ;;  %v3005_v3 = vld [vmem:[%s3099_s22 + $0xe8] sm:$0xff] }
 0x3c8   : > { %v2488_v6 = vmax.f32 %v2456_v47, 0.0  ;;  %v2455_v62 = vadd.f32 %v2996_v46, %v2423_v22  ;;  %v3006_v22 = vld [vmem:[%s3099_s22 + $0xe0] sm:$0xff] }
 0x3c9   : > { %v2944_v13 = vpop.f32.mrf.mxu0 }
 0x3ca   : > { %2520 = vst.msk [vmem:[%s4187_s11 + $0x98] sm:$0xff] %vm394_vm0, %v2488_v6  ;;  %v2487_v44 = vmax.f32 %v2455_v62, 0.0  ;;  %v2387_v63 = vmul.f32 %v2944_v13, %v4170_v48 }
 0x3cb   : > { %v2300_v29 = vpop.f32.mrf.mxu0 }
 0x3cc   : > { %2519 = vst.msk [vmem:[%s4187_s11 + $0x90] sm:$0xff] %vm394_vm0, %v2487_v44  ;;  %v2426_v51 = vadd.f32 %v4175_v14, %v2387_v63  ;;  %v2386_v27 = vmul.f32 %v4170_v48, %v2300_v29 }
 0x3ce   : > { %v2458_v59 = vadd.f32 %v2997_v56, %v2426_v51  ;;  %v2425_v43 = vadd.f32 %v4175_v14, %v2386_v27  ;;  %v3007_v51 = vld [vmem:[%s3099_s22 + $0xf8] sm:$0xff] }
 0x3d0   : > { %v2490_v39 = vmax.f32 %v2458_v59, 0.0  ;;  %v2457_v7 = vadd.f32 %v2998_v32, %v2425_v43  ;;  %v3008_v43 = vld [vmem:[%s3099_s22 + $0xf0] sm:$0xff] }
 0x3d1   : > { %v2947_v0 = vpop.f32.mrf.mxu0 }
 0x3d2   : > { %2522 = vst.msk [vmem:[%s4187_s11 + $0xa8] sm:$0xff] %vm394_vm0, %v2490_v39  ;;  %v2489_v33 = vmax.f32 %v2457_v7, 0.0  ;;  %v2389_v8 = vmul.f32 %v2947_v0, %v4170_v48 }
 0x3d3   : > { %v2310_v42 = vpop.f32.mrf.mxu0 }
 0x3d4   : > { %2521 = vst.msk [vmem:[%s4187_s11 + $0xa0] sm:$0xff] %vm394_vm0, %v2489_v33  ;;  %v2428_v50 = vadd.f32 %v4175_v14, %v2389_v8  ;;  %v2388_v34 = vmul.f32 %v4170_v48, %v2310_v42 }
 0x3d6   : > { %v2460_v9 = vadd.f32 %v2999_v58, %v2428_v50  ;;  %v2427_v1 = vadd.f32 %v4175_v14, %v2388_v34 }
 0x3d8   : > { %v2492_v52 = vmax.f32 %v2460_v9, 0.0  ;;  %v2459_v11 = vadd.f32 %v3000_v55, %v2427_v1 }
 0x3d9   : > { %v2950_v54 = vpop.f32.mrf.mxu0 }
 0x3da   : > { %2524 = vst.msk [vmem:[%s4187_s11 + $0xb8] sm:$0xff] %vm394_vm0, %v2492_v52  ;;  %v2491_v53 = vmax.f32 %v2459_v11, 0.0  ;;  %v2391_v61 = vmul.f32 %v2950_v54, %v4170_v48 }
 0x3db   : > { %v2320_v12 = vpop.f32.mrf.mxu0 }
 0x3dc   : > { %2523 = vst.msk [vmem:[%s4187_s11 + $0xb0] sm:$0xff] %vm394_vm0, %v2491_v53  ;;  %v2430_v36 = vadd.f32 %v4175_v14, %v2391_v61  ;;  %v2390_v35 = vmul.f32 %v4170_v48, %v2320_v12 }
 0x3de   : > { %v2462_v40 = vadd.f32 %v3001_v28, %v2430_v36  ;;  %v2429_v15 = vadd.f32 %v4175_v14, %v2390_v35 }
 0x3e0   : > { %v2494_v2 = vmax.f32 %v2462_v40, 0.0  ;;  %v2461_v38 = vadd.f32 %v3002_v57, %v2429_v15 }
 0x3e1   : > { %v2953_v23 = vpop.f32.mrf.mxu0 }
 0x3e2   : > { %2526 = vst.msk [vmem:[%s4187_s11 + $0xc8] sm:$0xff] %vm394_vm0, %v2494_v2  ;;  %v2493_v5 = vmax.f32 %v2461_v38, 0.0  ;;  %v2393_v45 = vmul.f32 %v2953_v23, %v4170_v48 }
 0x3e3   : > { %v2330_v4 = vpop.f32.mrf.mxu0 }
 0x3e4   : > { %2525 = vst.msk [vmem:[%s4187_s11 + $0xc0] sm:$0xff] %vm394_vm0, %v2493_v5  ;;  %v2432_v30 = vadd.f32 %v4175_v14, %v2393_v45  ;;  %v2392_v20 = vmul.f32 %v4170_v48, %v2330_v4 }
 0x3e6   : > { %v2464_v60 = vadd.f32 %v3003_v31, %v2432_v30  ;;  %v2431_v16 = vadd.f32 %v4175_v14, %v2392_v20 }
 0x3e8   : > { %v2496_v18 = vmax.f32 %v2464_v60, 0.0  ;;  %v2463_v10 = vadd.f32 %v3004_v25, %v2431_v16 }
 0x3e9   : > { %v2956_v24 = vpop.f32.mrf.mxu0 }
 0x3ea   : > { %2528 = vst.msk [vmem:[%s4187_s11 + $0xd8] sm:$0xff] %vm394_vm0, %v2496_v18  ;;  %v2495_v17 = vmax.f32 %v2463_v10, 0.0  ;;  %v2395_v21 = vmul.f32 %v2956_v24, %v4170_v48 }
 0x3eb   : > { %v2340_v41 = vpop.f32.mrf.mxu0 }
 0x3ec   : > { %2527 = vst.msk [vmem:[%s4187_s11 + $0xd0] sm:$0xff] %vm394_vm0, %v2495_v17  ;;  %v2434_v19 = vadd.f32 %v4175_v14, %v2395_v21  ;;  %v2394_v37 = vmul.f32 %v4170_v48, %v2340_v41 }
 0x3ee   : > { %v2466_v26 = vadd.f32 %v3005_v3, %v2434_v19  ;;  %v2433_v49 = vadd.f32 %v4175_v14, %v2394_v37 }
 0x3f0   : > { %v2498_v47 = vmax.f32 %v2466_v26, 0.0  ;;  %v2465_v6 = vadd.f32 %v3006_v22, %v2433_v49 }
 0x3f1   : > { %v2959_v46 = vpop.f32.mrf.mxu0 }
 0x3f2   : > { %2530 = vst.msk [vmem:[%s4187_s11 + $0xe8] sm:$0xff] %vm394_vm0, %v2498_v47  ;;  %v2497_v62 = vmax.f32 %v2465_v6, 0.0  ;;  %v2397_v13 = vmul.f32 %v2959_v46, %v4170_v48 }
 0x3f3   : > { %v2350_v44 = vpop.f32.mrf.mxu0 }
 0x3f4   : > { %2529 = vst.msk [vmem:[%s4187_s11 + $0xe0] sm:$0xff] %vm394_vm0, %v2497_v62  ;;  %v2436_v63 = vadd.f32 %v4175_v14, %v2397_v13  ;;  %v2396_v29 = vmul.f32 %v4170_v48, %v2350_v44 }
 0x3f6   : > { %v2468_v27 = vadd.f32 %v3007_v51, %v2436_v63  ;;  %v2435_v56 = vadd.f32 %v4175_v14, %v2396_v29 }
 0x3f8   : > { %v2500_v59 = vmax.f32 %v2468_v27, 0.0  ;;  %v2467_v39 = vadd.f32 %v3008_v43, %v2435_v56 }
 0x3fa   : > { %2532 = vst.msk [vmem:[%s4187_s11 + $0xf8] sm:$0xff] %vm394_vm0, %v2500_v59  ;;  %v2499_v32 = vmax.f32 %v2467_v39, 0.0 }
 0x3fc   : > { %2531 = vst.msk [vmem:[%s4187_s11 + $0xf0] sm:$0xff] %vm394_vm0, %v2499_v32 }
 0x3fd PF: > { %s20_s13 = sadd.s32 1, %s3015_s13  }
 0x3fe   : > { %p17_p4 = scmp.ge.s32.totalorder %s20_s13, 4  }
 0x400   :  { %19 = sbr.rel (!%p17_p4) target bundleno = 1 (0x1), region = 90 }

</bundles_post_ra>
